<compile_context>
chip_gen: v7x
topology: tpu7x:2x2x1
jax: 0.10.0
libtpu: 0.0.40
codegen_flags: <defaults>
</compile_context>

<pallas_src>
import numpy as np
import jax
import jax.numpy as jnp
from jax import lax
from jax.experimental import pallas as pl
from jax.experimental.pallas import tpu as pltpu  # noqa: F401 (imported for availability)

# ----------------------------- model config ---------------------------------
STATE_SIZE = 16      # np.prod(observation_shape.state)
ACTION_SIZE = 4
D_MODEL = 32         # SIZES[size]['d_model'] (small synthetic size)
N_HEAD = 2
DIM_FF = 64
N_LAYERS = 2         # TODO(synk): DemonstrationTransformerModel layer count unknown; use 2.
HEAD_HIDDEN = 256    # MlpModel hidden_sizes=[256]
T = 8                # sequence length (<= max_episode_length)
B = 2                # batch

DH = D_MODEL // N_HEAD
OUT_WIDTH = 2 * ACTION_SIZE + 1      # [mu | softplus(log_std) | value]
OUT_PAD = 128                        # lane-dense padded output width
LN_EPS = 1e-5


# ----------------------------- fused Pallas kernel ----------------------------
def _make_kernel(tb, batch):
    """Build the single-step kernel for a flattened (tb = T*B, feature) slab."""
    scale = 1.0 / float(np.sqrt(DH))

    def kernel(x_ref, pe_ref, emb_ref, qkv_ref, wo_ref, ln_ref,
               ffw1_ref, ffw2_ref, hw1_ref, hw2_ref, hb2_ref, o_ref):
        def layer_norm(s, g, b):
            mean = jnp.mean(s, axis=-1, keepdims=True)
            var = jnp.mean(jnp.square(s - mean), axis=-1, keepdims=True)
            return (s - mean) * lax.rsqrt(var + LN_EPS) * g + b

        def affine(inp, wb):
            # wb: (in_dim + 1, out_dim); last row is the bias (8-aligned offset).
            return (jnp.dot(inp, wb[:-1], preferred_element_type=jnp.float32)
                    + wb[-1:])

        # Time-major flatten: row r of the slab belongs to batch r % batch.
        rb = lax.broadcasted_iota(jnp.int32, (tb, tb), 0) % batch
        cb = lax.broadcasted_iota(jnp.int32, (tb, tb), 1) % batch
        same_batch = rb == cb

        # --- embedding + positional encoding ---------------------------------
        h = affine(x_ref[...].astype(jnp.float32), emb_ref[...]) + pe_ref[...]   # (TB, D)

        # --- post-norm transformer encoder layers (eval mode: dropout = id) ---
        for l in range(N_LAYERS):
            attn = jnp.zeros((tb, D_MODEL), jnp.float32)
            for hh in range(N_HEAD):
                q = affine(h, qkv_ref[(l * 3 + 0) * N_HEAD + hh])                # (TB, DH)
                k = affine(h, qkv_ref[(l * 3 + 1) * N_HEAD + hh])
                v = affine(h, qkv_ref[(l * 3 + 2) * N_HEAD + hh])
                s = lax.dot_general(q, k, (((1,), (1,)), ((), ())),
                                    preferred_element_type=jnp.float32) * scale  # (TB, TB)
                s = jnp.where(same_batch, s, -1e30)     # block-interleaved batch mask
                m = jnp.max(s, axis=-1, keepdims=True)
                p = jnp.exp(s - m)
                denom = jnp.sum(p, axis=-1, keepdims=True)
                o_h = jnp.dot(p, v, preferred_element_type=jnp.float32)          # (TB, DH)
                o_h = o_h * pl.reciprocal(denom, approx=True)   # normalize after PV
                attn = attn + jnp.dot(o_h, wo_ref[l * N_HEAD + hh],
                                      preferred_element_type=jnp.float32)        # (TB, D)
            attn = attn + ln_ref[l * 5 + 0]                     # output-proj bias, once
            h = layer_norm(h + attn, ln_ref[l * 5 + 1], ln_ref[l * 5 + 2])
            ff = jnp.maximum(affine(h, ffw1_ref[l]), 0.0)                        # (TB, FF)
            ff = affine(ff, ffw2_ref[l])                                         # (TB, D)
            h = layer_norm(h + ff, ln_ref[l * 5 + 3], ln_ref[l * 5 + 4])

        # --- fused pi / value heads -------------------------------------------
        hid = jnp.maximum(affine(h, hw1_ref[...]), 0.0)                          # (TB, 2*HH)
        out = (jnp.dot(hid, hw2_ref[...], preferred_element_type=jnp.float32)
               + hb2_ref[...])                                                   # (TB, 128)

        # numerically stable softplus on the log_std columns only
        sp = jnp.maximum(out, 0.0) + jnp.log(1.0 + jnp.exp(-jnp.abs(out)))
        col = lax.broadcasted_iota(jnp.int32, out.shape, 1)
        is_log_std = (col >= ACTION_SIZE) & (col < 2 * ACTION_SIZE)
        o_ref[...] = jnp.where(is_log_std, sp, out).astype(o_ref.dtype)

    return kernel


# ----------------------------- parameters -------------------------------------
def _uniform_init(key, shape, fan_in):
    bound = 1.0 / float(np.sqrt(fan_in))
    return jax.random.uniform(key, shape, jnp.float32, -bound, bound)


def init_params(key):
    keys = iter(jax.random.split(key, 64))

    def lin(in_d, out_d):
        return (_uniform_init(next(keys), (in_d, out_d), in_d),
                _uniform_init(next(keys), (out_d,), in_d))

    params = {}
    params['emb_w'], params['emb_b'] = lin(STATE_SIZE, D_MODEL)
    layers = []
    for _ in range(N_LAYERS):
        p = {}
        p['wq'], p['bq'] = lin(D_MODEL, D_MODEL)
        p['wk'], p['bk'] = lin(D_MODEL, D_MODEL)
        p['wv'], p['bv'] = lin(D_MODEL, D_MODEL)
        p['wo'], p['bo'] = lin(D_MODEL, D_MODEL)
        p['ln1_g'], p['ln1_b'] = jnp.ones((D_MODEL,), jnp.float32), jnp.zeros((D_MODEL,), jnp.float32)
        p['ff_w1'], p['ff_b1'] = lin(D_MODEL, DIM_FF)
        p['ff_w2'], p['ff_b2'] = lin(DIM_FF, D_MODEL)
        p['ln2_g'], p['ln2_b'] = jnp.ones((D_MODEL,), jnp.float32), jnp.zeros((D_MODEL,), jnp.float32)
        layers.append(p)
    params['layers'] = layers
    params['pi_w1'], params['pi_b1'] = lin(D_MODEL, HEAD_HIDDEN)
    params['pi_w2'], params['pi_b2'] = lin(HEAD_HIDDEN, 2 * ACTION_SIZE)
    params['v_w1'], params['v_b1'] = lin(D_MODEL, HEAD_HIDDEN)
    params['v_w2'], params['v_b2'] = lin(HEAD_HIDDEN, 1)
    return params


def pack_params(p):
    """Pack weights into a few VMEM slabs; biases merged as a last (8-aligned) row.

    Note: layout assumes [Wq|Wk|Wv] column-major per head when converting from a
    PyTorch nn.MultiheadAttention in_proj_weight; here we init our own params.
    """
    layers = p['layers']
    packed = {}
    packed['emb_wb'] = jnp.concatenate([p['emb_w'], p['emb_b'][None, :]], axis=0)     # (S+1, D)

    qkv_blocks = []
    for lp in layers:
        for w_key, b_key in (('wq', 'bq'), ('wk', 'bk'), ('wv', 'bv')):
            for h in range(N_HEAD):
                w_h = lp[w_key][:, h * DH:(h + 1) * DH]                               # (D, DH)
                b_h = lp[b_key][h * DH:(h + 1) * DH][None, :]                         # (1, DH)
                qkv_blocks.append(jnp.concatenate([w_h, b_h], axis=0))                # (D+1, DH)
    packed['qkv_wb'] = jnp.stack(qkv_blocks)                                          # (L*3*H, D+1, DH)

    packed['wo_heads'] = jnp.stack([lp['wo'][h * DH:(h + 1) * DH, :]
                                    for lp in layers for h in range(N_HEAD)])         # (L*H, DH, D)
    packed['ln_vecs'] = jnp.stack([v[None, :] for lp in layers
                                   for v in (lp['bo'], lp['ln1_g'], lp['ln1_b'],
                                             lp['ln2_g'], lp['ln2_b'])])              # (L*5, 1, D)
    packed['ff_w1b'] = jnp.stack([jnp.concatenate([lp['ff_w1'], lp['ff_b1'][None, :]], axis=0)
                                  for lp in layers])                                  # (L, D+1, FF)
    packed['ff_w2b'] = jnp.stack([jnp.concatenate([lp['ff_w2'], lp['ff_b2'][None, :]], axis=0)
                                  for lp in layers])                                  # (L, FF+1, D)

    head_w1 = jnp.concatenate([p['pi_w1'], p['v_w1']], axis=1)                        # (D, 2*HH)
    head_b1 = jnp.concatenate([p['pi_b1'], p['v_b1']])[None, :]                       # (1, 2*HH)
    packed['head_w1b'] = jnp.concatenate([head_w1, head_b1], axis=0)                  # (D+1, 2*HH)

    # block-diagonal, lane-padded second layer -> (2*HH, 128): [mu | log_std_raw | value | 0...]
    head_w2 = jnp.zeros((2 * HEAD_HIDDEN, OUT_PAD), jnp.float32)
    head_w2 = head_w2.at[:HEAD_HIDDEN, :2 * ACTION_SIZE].set(p['pi_w2'])
    head_w2 = head_w2.at[HEAD_HIDDEN:, 2 * ACTION_SIZE:OUT_WIDTH].set(p['v_w2'])
    packed['head_w2'] = head_w2
    head_b2 = jnp.zeros((1, OUT_PAD), jnp.float32)
    head_b2 = head_b2.at[0, :2 * ACTION_SIZE].set(p['pi_b2'])
    head_b2 = head_b2.at[0, 2 * ACTION_SIZE:OUT_WIDTH].set(p['v_b2'])
    packed['head_b2'] = head_b2
    return packed


def sinusoidal_pe(t, d):
    pos = np.arange(t)[:, None].astype(np.float32)
    i = np.arange(d)[None, :]
    angle = pos / np.power(10000.0, (2 * (i // 2)) / d)
    return np.where(i % 2 == 0, np.sin(angle), np.cos(angle)).astype(np.float32)


# ----------------------------- forward pass -----------------------------------
_WEIGHT_ORDER = ('emb_wb', 'qkv_wb', 'wo_heads', 'ln_vecs',
                 'ff_w1b', 'ff_w2b', 'head_w1b', 'head_w2', 'head_b2')


def transformer_model_forward(packed, observation_state, prev_action, prev_reward, rnn_state):
    # observation.state: (T, B, state_size)  (lead_dim = 2 in infer_leading_dims)
    # TODO(synk): DemonstrationTransformerModel source not provided; prev_action /
    # prev_reward are unused here and rnn_state is passed through unchanged.
    t_, b_, s = observation_state.shape
    tb = t_ * b_
    x_flat = observation_state.reshape(tb, s)                          # free, time-major order kept
    pe_flat = jnp.asarray(np.repeat(sinusoidal_pe(t_, D_MODEL), b_, axis=0))   # row r -> pe[r // B]

    # Single-step kernel (no grid): on v6e/v5e a batch grid is a serial loop with
    # per-step overhead; on v7x 2-TC sharding of B=2 would duplicate the weight
    # prologue for <1us of compute.  All operands are whole-array VMEM blocks.
    out = pl.pallas_call(
        _make_kernel(tb, b_),
        out_shape=jax.ShapeDtypeStruct((tb, OUT_PAD), jnp.float32),
    )(x_flat, pe_flat, *[packed[k] for k in _WEIGHT_ORDER])

    out = out[:, :OUT_WIDTH].reshape(t_, b_, OUT_WIDTH)                # (T, B, 2*A+1)
    mu = out[..., :ACTION_SIZE]
    log_std = out[..., ACTION_SIZE:2 * ACTION_SIZE]
    value = out[..., 2 * ACTION_SIZE:]
    return mu, log_std, value, rnn_state


# ----------------------------- main -------------------------------------------
if __name__ == "__main__":
    params = init_params(jax.random.PRNGKey(0))
    packed = pack_params(params)

    k_obs, k_act, k_rew = jax.random.split(jax.random.PRNGKey(0), 3)
    observation_state = jax.random.normal(k_obs, (T, B, STATE_SIZE), jnp.float32)
    prev_action = jax.random.normal(k_act, (T, B, ACTION_SIZE), jnp.float32)
    prev_reward = jax.random.normal(k_rew, (T, B), jnp.float32)
    rnn_state = jnp.zeros((1, B, D_MODEL), jnp.float32)

    fwd = jax.jit(transformer_model_forward)
    mu, log_std, value, rnn_state_out = fwd(packed, observation_state,
                                            prev_action, prev_reward, rnn_state)
    jax.block_until_ready((mu, log_std, value, rnn_state_out))

    assert mu.shape == (T, B, ACTION_SIZE)
    assert log_std.shape == (T, B, ACTION_SIZE)
    assert value.shape == (T, B, 1)
    assert bool(jnp.all(log_std >= 0.0))            # softplus output is non-negative
    assert bool(jnp.all(jnp.isfinite(mu))) and bool(jnp.all(jnp.isfinite(value)))
    assert bool(jnp.all(jnp.isfinite(log_std)))
    print("KERNEL_OK")
</pallas_src>

<mosaic_0001>
module attributes {stable_mosaic.version = 11 : i64} {
  func.func @kernel(%arg0: memref<16x16xf32, #tpu.memory_space<vmem>>, %arg1: memref<16x32xf32, #tpu.memory_space<vmem>>, %arg2: memref<17x32xf32, #tpu.memory_space<vmem>>, %arg3: memref<12x33x16xf32, #tpu.memory_space<vmem>>, %arg4: memref<4x16x32xf32, #tpu.memory_space<vmem>>, %arg5: memref<10x1x32xf32, #tpu.memory_space<vmem>>, %arg6: memref<2x33x64xf32, #tpu.memory_space<vmem>>, %arg7: memref<2x65x32xf32, #tpu.memory_space<vmem>>, %arg8: memref<33x512xf32, #tpu.memory_space<vmem>>, %arg9: memref<512x128xf32, #tpu.memory_space<vmem>>, %arg10: memref<1x128xf32, #tpu.memory_space<vmem>>, %arg11: memref<16x128xf32, #tpu.memory_space<vmem>>) attributes {dimension_semantics = [], scalar_prefetch = 0 : i64, scratch_operands = 0 : i64, tpu.core_type = #tpu.core_type<tc>} {
    %0 = tpu.iota {dimensions = array<i32: 0>} : vector<16x16xi32>
    %c2_i32 = arith.constant 2 : i32
    %c0_i32 = arith.constant 0 : i32
    %1 = arith.cmpi eq, %c2_i32, %c0_i32 : i32
    %c1_i32 = arith.constant 1 : i32
    %2 = arith.select %1, %c1_i32, %c2_i32 : i32
    %3 = vector.broadcast %2 : i32 to vector<16x16xi32>
    %4 = arith.remsi %0, %3 : vector<16x16xi32>
    %c0_i32_0 = arith.constant 0 : i32
    %5 = vector.broadcast %c0_i32_0 : i32 to vector<16x16xi32>
    %6 = arith.cmpi ne, %4, %5 : vector<16x16xi32>
    %c0_i32_1 = arith.constant 0 : i32
    %7 = vector.broadcast %c0_i32_1 : i32 to vector<16x16xi32>
    %8 = arith.cmpi slt, %4, %7 : vector<16x16xi32>
    %c0_i32_2 = arith.constant 0 : i32
    %9 = arith.cmpi slt, %2, %c0_i32_2 : i32
    %10 = vector.broadcast %9 : i1 to vector<16x16xi1>
    %11 = vector.broadcast %10 : vector<16x16xi1> to vector<16x16xi1>
    %12 = arith.xori %8, %11 : vector<16x16xi1>
    %13 = arith.andi %12, %6 : vector<16x16xi1>
    %14 = vector.broadcast %2 : i32 to vector<16x16xi32>
    %15 = arith.addi %4, %14 : vector<16x16xi32>
    %16 = arith.select %13, %15, %4 : vector<16x16xi1>, vector<16x16xi32>
    %17 = tpu.iota {dimensions = array<i32: 1>} : vector<16x16xi32>
    %c2_i32_3 = arith.constant 2 : i32
    %c0_i32_4 = arith.constant 0 : i32
    %18 = arith.cmpi eq, %c2_i32_3, %c0_i32_4 : i32
    %c1_i32_5 = arith.constant 1 : i32
    %19 = arith.select %18, %c1_i32_5, %c2_i32_3 : i32
    %20 = vector.broadcast %19 : i32 to vector<16x16xi32>
    %21 = arith.remsi %17, %20 : vector<16x16xi32>
    %c0_i32_6 = arith.constant 0 : i32
    %22 = vector.broadcast %c0_i32_6 : i32 to vector<16x16xi32>
    %23 = arith.cmpi ne, %21, %22 : vector<16x16xi32>
    %c0_i32_7 = arith.constant 0 : i32
    %24 = vector.broadcast %c0_i32_7 : i32 to vector<16x16xi32>
    %25 = arith.cmpi slt, %21, %24 : vector<16x16xi32>
    %c0_i32_8 = arith.constant 0 : i32
    %26 = arith.cmpi slt, %19, %c0_i32_8 : i32
    %27 = vector.broadcast %26 : i1 to vector<16x16xi1>
    %28 = vector.broadcast %27 : vector<16x16xi1> to vector<16x16xi1>
    %29 = arith.xori %25, %28 : vector<16x16xi1>
    %30 = arith.andi %29, %23 : vector<16x16xi1>
    %31 = vector.broadcast %19 : i32 to vector<16x16xi32>
    %32 = arith.addi %21, %31 : vector<16x16xi32>
    %33 = arith.select %30, %32, %21 : vector<16x16xi1>, vector<16x16xi32>
    %34 = arith.cmpi eq, %16, %33 : vector<16x16xi32>
    %c0 = arith.constant 0 : index
    %c0_9 = arith.constant 0 : index
    %35 = vector.load %arg0[%c0, %c0_9] : memref<16x16xf32, #tpu.memory_space<vmem>>, vector<16x16xf32>
    %c0_10 = arith.constant 0 : index
    %c0_11 = arith.constant 0 : index
    %36 = vector.load %arg2[%c0_10, %c0_11] : memref<17x32xf32, #tpu.memory_space<vmem>>, vector<17x32xf32>
    %37 = vector.extract_strided_slice %36 {offsets = [0, 0], sizes = [16, 32], strides = [1, 1]} : vector<17x32xf32> to vector<16x32xf32>
    %cst = arith.constant dense<0.000000e+00> : vector<16x32xf32>
    %38 = tpu.matmul %35, %37, %cst {dimension_numbers = #tpu.dot_dimension_numbers<[1], [0], [0], [1], [0, 0, 1, 1], [], []>} : vector<16x16xf32>, vector<16x32xf32>, vector<16x32xf32> -> vector<16x32xf32>
    %39 = vector.extract_strided_slice %36 {offsets = [16, 0], sizes = [1, 32], strides = [1, 1]} : vector<17x32xf32> to vector<1x32xf32>
    %40 = vector.broadcast %39 : vector<1x32xf32> to vector<16x32xf32>
    %41 = arith.addf %38, %40 : vector<16x32xf32>
    %c0_12 = arith.constant 0 : index
    %c0_13 = arith.constant 0 : index
    %42 = vector.load %arg1[%c0_12, %c0_13] : memref<16x32xf32, #tpu.memory_space<vmem>>, vector<16x32xf32>
    %43 = arith.addf %41, %42 : vector<16x32xf32>
    %cst_14 = arith.constant 0.000000e+00 : f32
    %44 = vector.broadcast %cst_14 : f32 to vector<16x32xf32>
    %c0_15 = arith.constant 0 : index
    %c0_16 = arith.constant 0 : index
    %c0_17 = arith.constant 0 : index
    %45 = vector.load %arg3[%c0_15, %c0_16, %c0_17] : memref<12x33x16xf32, #tpu.memory_space<vmem>>, vector<1x33x16xf32>
    %46 = vector.shape_cast %45 : vector<1x33x16xf32> to vector<33x16xf32>
    %47 = vector.extract_strided_slice %46 {offsets = [0, 0], sizes = [32, 16], strides = [1, 1]} : vector<33x16xf32> to vector<32x16xf32>
    %cst_18 = arith.constant dense<0.000000e+00> : vector<16x16xf32>
    %48 = tpu.matmul %43, %47, %cst_18 {dimension_numbers = #tpu.dot_dimension_numbers<[1], [0], [0], [1], [0, 0, 1, 1], [], []>} : vector<16x32xf32>, vector<32x16xf32>, vector<16x16xf32> -> vector<16x16xf32>
    %49 = vector.extract_strided_slice %46 {offsets = [32, 0], sizes = [1, 16], strides = [1, 1]} : vector<33x16xf32> to vector<1x16xf32>
    %50 = vector.broadcast %49 : vector<1x16xf32> to vector<16x16xf32>
    %51 = arith.addf %48, %50 : vector<16x16xf32>
    %c2 = arith.constant 2 : index
    %c0_19 = arith.constant 0 : index
    %c0_20 = arith.constant 0 : index
    %52 = vector.load %arg3[%c2, %c0_19, %c0_20] : memref<12x33x16xf32, #tpu.memory_space<vmem>>, vector<1x33x16xf32>
    %53 = vector.shape_cast %52 : vector<1x33x16xf32> to vector<33x16xf32>
    %54 = vector.extract_strided_slice %53 {offsets = [0, 0], sizes = [32, 16], strides = [1, 1]} : vector<33x16xf32> to vector<32x16xf32>
    %cst_21 = arith.constant dense<0.000000e+00> : vector<16x16xf32>
    %55 = tpu.matmul %43, %54, %cst_21 {dimension_numbers = #tpu.dot_dimension_numbers<[1], [0], [0], [1], [0, 0, 1, 1], [], []>} : vector<16x32xf32>, vector<32x16xf32>, vector<16x16xf32> -> vector<16x16xf32>
    %56 = vector.extract_strided_slice %53 {offsets = [32, 0], sizes = [1, 16], strides = [1, 1]} : vector<33x16xf32> to vector<1x16xf32>
    %57 = vector.broadcast %56 : vector<1x16xf32> to vector<16x16xf32>
    %58 = arith.addf %55, %57 : vector<16x16xf32>
    %c4 = arith.constant 4 : index
    %c0_22 = arith.constant 0 : index
    %c0_23 = arith.constant 0 : index
    %59 = vector.load %arg3[%c4, %c0_22, %c0_23] : memref<12x33x16xf32, #tpu.memory_space<vmem>>, vector<1x33x16xf32>
    %60 = vector.shape_cast %59 : vector<1x33x16xf32> to vector<33x16xf32>
    %61 = vector.extract_strided_slice %60 {offsets = [0, 0], sizes = [32, 16], strides = [1, 1]} : vector<33x16xf32> to vector<32x16xf32>
    %cst_24 = arith.constant dense<0.000000e+00> : vector<16x16xf32>
    %62 = tpu.matmul %43, %61, %cst_24 {dimension_numbers = #tpu.dot_dimension_numbers<[1], [0], [0], [1], [0, 0, 1, 1], [], []>} : vector<16x32xf32>, vector<32x16xf32>, vector<16x16xf32> -> vector<16x16xf32>
    %63 = vector.extract_strided_slice %60 {offsets = [32, 0], sizes = [1, 16], strides = [1, 1]} : vector<33x16xf32> to vector<1x16xf32>
    %64 = vector.broadcast %63 : vector<1x16xf32> to vector<16x16xf32>
    %65 = arith.addf %62, %64 : vector<16x16xf32>
    %cst_25 = arith.constant dense<0.000000e+00> : vector<16x16xf32>
    %66 = tpu.matmul %51, %58, %cst_25 {dimension_numbers = #tpu.dot_dimension_numbers<[1], [1], [0], [0], [0, 0, 1, 0], [], []>} : vector<16x16xf32>, vector<16x16xf32>, vector<16x16xf32> -> vector<16x16xf32>
    %cst_26 = arith.constant 2.500000e-01 : f32
    %67 = vector.broadcast %cst_26 : f32 to vector<16x16xf32>
    %68 = arith.mulf %66, %67 : vector<16x16xf32>
    %cst_27 = arith.constant -1.000000e+30 : f32
    %69 = vector.broadcast %cst_27 : f32 to vector<16x16xf32>
    %70 = arith.select %34, %68, %69 : vector<16x16xi1>, vector<16x16xf32>
    %cst_28 = arith.constant dense<0xFF800000> : vector<16xf32>
    %71 = vector.multi_reduction <maximumf>, %70, %cst_28 [1] : vector<16x16xf32> to vector<16xf32>
    %72 = vector.shape_cast %71 : vector<16xf32> to vector<16x1xf32>
    %73 = vector.broadcast %72 : vector<16x1xf32> to vector<16x16xf32>
    %74 = arith.subf %70, %73 : vector<16x16xf32>
    %75 = math.exp %74 : vector<16x16xf32>
    %cst_29 = arith.constant dense<0.000000e+00> : vector<16xf32>
    %76 = vector.multi_reduction <add>, %75, %cst_29 [1] : vector<16x16xf32> to vector<16xf32>
    %77 = vector.shape_cast %76 : vector<16xf32> to vector<16x1xf32>
    %cst_30 = arith.constant dense<0.000000e+00> : vector<16x16xf32>
    %78 = tpu.matmul %75, %65, %cst_30 {dimension_numbers = #tpu.dot_dimension_numbers<[1], [0], [0], [1], [0, 0, 1, 1], [], []>} : vector<16x16xf32>, vector<16x16xf32>, vector<16x16xf32> -> vector<16x16xf32>
    %79 = tpu.reciprocal %77 {approx = true} : vector<16x1xf32> -> vector<16x1xf32>
    %80 = vector.broadcast %79 : vector<16x1xf32> to vector<16x16xf32>
    %81 = arith.mulf %78, %80 : vector<16x16xf32>
    %c0_31 = arith.constant 0 : index
    %c0_32 = arith.constant 0 : index
    %c0_33 = arith.constant 0 : index
    %82 = vector.load %arg4[%c0_31, %c0_32, %c0_33] : memref<4x16x32xf32, #tpu.memory_space<vmem>>, vector<1x16x32xf32>
    %83 = vector.shape_cast %82 : vector<1x16x32xf32> to vector<16x32xf32>
    %cst_34 = arith.constant dense<0.000000e+00> : vector<16x32xf32>
    %84 = tpu.matmul %81, %83, %cst_34 {dimension_numbers = #tpu.dot_dimension_numbers<[1], [0], [0], [1], [0, 0, 1, 1], [], []>} : vector<16x16xf32>, vector<16x32xf32>, vector<16x32xf32> -> vector<16x32xf32>
    %85 = arith.addf %44, %84 : vector<16x32xf32>
    %c1 = arith.constant 1 : index
    %c0_35 = arith.constant 0 : index
    %c0_36 = arith.constant 0 : index
    %86 = vector.load %arg3[%c1, %c0_35, %c0_36] : memref<12x33x16xf32, #tpu.memory_space<vmem>>, vector<1x33x16xf32>
    %87 = vector.shape_cast %86 : vector<1x33x16xf32> to vector<33x16xf32>
    %88 = vector.extract_strided_slice %87 {offsets = [0, 0], sizes = [32, 16], strides = [1, 1]} : vector<33x16xf32> to vector<32x16xf32>
    %cst_37 = arith.constant dense<0.000000e+00> : vector<16x16xf32>
    %89 = tpu.matmul %43, %88, %cst_37 {dimension_numbers = #tpu.dot_dimension_numbers<[1], [0], [0], [1], [0, 0, 1, 1], [], []>} : vector<16x32xf32>, vector<32x16xf32>, vector<16x16xf32> -> vector<16x16xf32>
    %90 = vector.extract_strided_slice %87 {offsets = [32, 0], sizes = [1, 16], strides = [1, 1]} : vector<33x16xf32> to vector<1x16xf32>
    %91 = vector.broadcast %90 : vector<1x16xf32> to vector<16x16xf32>
    %92 = arith.addf %89, %91 : vector<16x16xf32>
    %c3 = arith.constant 3 : index
    %c0_38 = arith.constant 0 : index
    %c0_39 = arith.constant 0 : index
    %93 = vector.load %arg3[%c3, %c0_38, %c0_39] : memref<12x33x16xf32, #tpu.memory_space<vmem>>, vector<1x33x16xf32>
    %94 = vector.shape_cast %93 : vector<1x33x16xf32> to vector<33x16xf32>
    %95 = vector.extract_strided_slice %94 {offsets = [0, 0], sizes = [32, 16], strides = [1, 1]} : vector<33x16xf32> to vector<32x16xf32>
    %cst_40 = arith.constant dense<0.000000e+00> : vector<16x16xf32>
    %96 = tpu.matmul %43, %95, %cst_40 {dimension_numbers = #tpu.dot_dimension_numbers<[1], [0], [0], [1], [0, 0, 1, 1], [], []>} : vector<16x32xf32>, vector<32x16xf32>, vector<16x16xf32> -> vector<16x16xf32>
    %97 = vector.extract_strided_slice %94 {offsets = [32, 0], sizes = [1, 16], strides = [1, 1]} : vector<33x16xf32> to vector<1x16xf32>
    %98 = vector.broadcast %97 : vector<1x16xf32> to vector<16x16xf32>
    %99 = arith.addf %96, %98 : vector<16x16xf32>
    %c5 = arith.constant 5 : index
    %c0_41 = arith.constant 0 : index
    %c0_42 = arith.constant 0 : index
    %100 = vector.load %arg3[%c5, %c0_41, %c0_42] : memref<12x33x16xf32, #tpu.memory_space<vmem>>, vector<1x33x16xf32>
    %101 = vector.shape_cast %100 : vector<1x33x16xf32> to vector<33x16xf32>
    %102 = vector.extract_strided_slice %101 {offsets = [0, 0], sizes = [32, 16], strides = [1, 1]} : vector<33x16xf32> to vector<32x16xf32>
    %cst_43 = arith.constant dense<0.000000e+00> : vector<16x16xf32>
    %103 = tpu.matmul %43, %102, %cst_43 {dimension_numbers = #tpu.dot_dimension_numbers<[1], [0], [0], [1], [0, 0, 1, 1], [], []>} : vector<16x32xf32>, vector<32x16xf32>, vector<16x16xf32> -> vector<16x16xf32>
    %104 = vector.extract_strided_slice %101 {offsets = [32, 0], sizes = [1, 16], strides = [1, 1]} : vector<33x16xf32> to vector<1x16xf32>
    %105 = vector.broadcast %104 : vector<1x16xf32> to vector<16x16xf32>
    %106 = arith.addf %103, %105 : vector<16x16xf32>
    %cst_44 = arith.constant dense<0.000000e+00> : vector<16x16xf32>
    %107 = tpu.matmul %92, %99, %cst_44 {dimension_numbers = #tpu.dot_dimension_numbers<[1], [1], [0], [0], [0, 0, 1, 0], [], []>} : vector<16x16xf32>, vector<16x16xf32>, vector<16x16xf32> -> vector<16x16xf32>
    %cst_45 = arith.constant 2.500000e-01 : f32
    %108 = vector.broadcast %cst_45 : f32 to vector<16x16xf32>
    %109 = arith.mulf %107, %108 : vector<16x16xf32>
    %cst_46 = arith.constant -1.000000e+30 : f32
    %110 = vector.broadcast %cst_46 : f32 to vector<16x16xf32>
    %111 = arith.select %34, %109, %110 : vector<16x16xi1>, vector<16x16xf32>
    %cst_47 = arith.constant dense<0xFF800000> : vector<16xf32>
    %112 = vector.multi_reduction <maximumf>, %111, %cst_47 [1] : vector<16x16xf32> to vector<16xf32>
    %113 = vector.shape_cast %112 : vector<16xf32> to vector<16x1xf32>
    %114 = vector.broadcast %113 : vector<16x1xf32> to vector<16x16xf32>
    %115 = arith.subf %111, %114 : vector<16x16xf32>
    %116 = math.exp %115 : vector<16x16xf32>
    %cst_48 = arith.constant dense<0.000000e+00> : vector<16xf32>
    %117 = vector.multi_reduction <add>, %116, %cst_48 [1] : vector<16x16xf32> to vector<16xf32>
    %118 = vector.shape_cast %117 : vector<16xf32> to vector<16x1xf32>
    %cst_49 = arith.constant dense<0.000000e+00> : vector<16x16xf32>
    %119 = tpu.matmul %116, %106, %cst_49 {dimension_numbers = #tpu.dot_dimension_numbers<[1], [0], [0], [1], [0, 0, 1, 1], [], []>} : vector<16x16xf32>, vector<16x16xf32>, vector<16x16xf32> -> vector<16x16xf32>
    %120 = tpu.reciprocal %118 {approx = true} : vector<16x1xf32> -> vector<16x1xf32>
    %121 = vector.broadcast %120 : vector<16x1xf32> to vector<16x16xf32>
    %122 = arith.mulf %119, %121 : vector<16x16xf32>
    %c1_50 = arith.constant 1 : index
    %c0_51 = arith.constant 0 : index
    %c0_52 = arith.constant 0 : index
    %123 = vector.load %arg4[%c1_50, %c0_51, %c0_52] : memref<4x16x32xf32, #tpu.memory_space<vmem>>, vector<1x16x32xf32>
    %124 = vector.shape_cast %123 : vector<1x16x32xf32> to vector<16x32xf32>
    %cst_53 = arith.constant dense<0.000000e+00> : vector<16x32xf32>
    %125 = tpu.matmul %122, %124, %cst_53 {dimension_numbers = #tpu.dot_dimension_numbers<[1], [0], [0], [1], [0, 0, 1, 1], [], []>} : vector<16x16xf32>, vector<16x32xf32>, vector<16x32xf32> -> vector<16x32xf32>
    %126 = arith.addf %85, %125 : vector<16x32xf32>
    %c0_54 = arith.constant 0 : index
    %c0_55 = arith.constant 0 : index
    %c0_56 = arith.constant 0 : index
    %127 = vector.load %arg5[%c0_54, %c0_55, %c0_56] : memref<10x1x32xf32, #tpu.memory_space<vmem>>, vector<1x1x32xf32>
    %128 = vector.shape_cast %127 : vector<1x1x32xf32> to vector<1x32xf32>
    %129 = vector.broadcast %128 : vector<1x32xf32> to vector<16x32xf32>
    %130 = arith.addf %126, %129 : vector<16x32xf32>
    %131 = arith.addf %43, %130 : vector<16x32xf32>
    %c1_57 = arith.constant 1 : index
    %c0_58 = arith.constant 0 : index
    %c0_59 = arith.constant 0 : index
    %132 = vector.load %arg5[%c1_57, %c0_58, %c0_59] : memref<10x1x32xf32, #tpu.memory_space<vmem>>, vector<1x1x32xf32>
    %133 = vector.shape_cast %132 : vector<1x1x32xf32> to vector<1x32xf32>
    %c2_60 = arith.constant 2 : index
    %c0_61 = arith.constant 0 : index
    %c0_62 = arith.constant 0 : index
    %134 = vector.load %arg5[%c2_60, %c0_61, %c0_62] : memref<10x1x32xf32, #tpu.memory_space<vmem>>, vector<1x1x32xf32>
    %135 = vector.shape_cast %134 : vector<1x1x32xf32> to vector<1x32xf32>
    %cst_63 = arith.constant dense<0.000000e+00> : vector<16xf32>
    %136 = vector.multi_reduction <add>, %131, %cst_63 [1] : vector<16x32xf32> to vector<16xf32>
    %137 = vector.shape_cast %136 : vector<16xf32> to vector<16x1xf32>
    %cst_64 = arith.constant 3.200000e+01 : f32
    %138 = vector.broadcast %cst_64 : f32 to vector<16x1xf32>
    %139 = arith.divf %137, %138 : vector<16x1xf32>
    %140 = vector.broadcast %139 : vector<16x1xf32> to vector<16x32xf32>
    %141 = arith.subf %131, %140 : vector<16x32xf32>
    %142 = arith.mulf %141, %141 : vector<16x32xf32>
    %cst_65 = arith.constant dense<0.000000e+00> : vector<16xf32>
    %143 = vector.multi_reduction <add>, %142, %cst_65 [1] : vector<16x32xf32> to vector<16xf32>
    %144 = vector.shape_cast %143 : vector<16xf32> to vector<16x1xf32>
    %cst_66 = arith.constant 3.200000e+01 : f32
    %145 = vector.broadcast %cst_66 : f32 to vector<16x1xf32>
    %146 = arith.divf %144, %145 : vector<16x1xf32>
    %147 = vector.broadcast %139 : vector<16x1xf32> to vector<16x32xf32>
    %148 = arith.subf %131, %147 : vector<16x32xf32>
    %cst_67 = arith.constant 9.99999974E-6 : f32
    %149 = vector.broadcast %cst_67 : f32 to vector<16x1xf32>
    %150 = arith.addf %146, %149 : vector<16x1xf32>
    %151 = math.rsqrt %150 : vector<16x1xf32>
    %152 = vector.broadcast %151 : vector<16x1xf32> to vector<16x32xf32>
    %153 = arith.mulf %148, %152 : vector<16x32xf32>
    %154 = vector.broadcast %133 : vector<1x32xf32> to vector<16x32xf32>
    %155 = arith.mulf %153, %154 : vector<16x32xf32>
    %156 = vector.broadcast %135 : vector<1x32xf32> to vector<16x32xf32>
    %157 = arith.addf %155, %156 : vector<16x32xf32>
    %c0_68 = arith.constant 0 : index
    %c0_69 = arith.constant 0 : index
    %c0_70 = arith.constant 0 : index
    %158 = vector.load %arg6[%c0_68, %c0_69, %c0_70] : memref<2x33x64xf32, #tpu.memory_space<vmem>>, vector<1x33x64xf32>
    %159 = vector.shape_cast %158 : vector<1x33x64xf32> to vector<33x64xf32>
    %160 = vector.extract_strided_slice %159 {offsets = [0, 0], sizes = [32, 64], strides = [1, 1]} : vector<33x64xf32> to vector<32x64xf32>
    %cst_71 = arith.constant dense<0.000000e+00> : vector<16x64xf32>
    %161 = tpu.matmul %157, %160, %cst_71 {dimension_numbers = #tpu.dot_dimension_numbers<[1], [0], [0], [1], [0, 0, 1, 1], [], []>} : vector<16x32xf32>, vector<32x64xf32>, vector<16x64xf32> -> vector<16x64xf32>
    %162 = vector.extract_strided_slice %159 {offsets = [32, 0], sizes = [1, 64], strides = [1, 1]} : vector<33x64xf32> to vector<1x64xf32>
    %163 = vector.broadcast %162 : vector<1x64xf32> to vector<16x64xf32>
    %164 = arith.addf %161, %163 : vector<16x64xf32>
    %cst_72 = arith.constant 0.000000e+00 : f32
    %165 = vector.broadcast %cst_72 : f32 to vector<16x64xf32>
    %166 = arith.maximumf %164, %165 : vector<16x64xf32>
    %c0_73 = arith.constant 0 : index
    %c0_74 = arith.constant 0 : index
    %c0_75 = arith.constant 0 : index
    %167 = vector.load %arg7[%c0_73, %c0_74, %c0_75] : memref<2x65x32xf32, #tpu.memory_space<vmem>>, vector<1x65x32xf32>
    %168 = vector.shape_cast %167 : vector<1x65x32xf32> to vector<65x32xf32>
    %169 = vector.extract_strided_slice %168 {offsets = [0, 0], sizes = [64, 32], strides = [1, 1]} : vector<65x32xf32> to vector<64x32xf32>
    %cst_76 = arith.constant dense<0.000000e+00> : vector<16x32xf32>
    %170 = tpu.matmul %166, %169, %cst_76 {dimension_numbers = #tpu.dot_dimension_numbers<[1], [0], [0], [1], [0, 0, 1, 1], [], []>} : vector<16x64xf32>, vector<64x32xf32>, vector<16x32xf32> -> vector<16x32xf32>
    %171 = vector.extract_strided_slice %168 {offsets = [64, 0], sizes = [1, 32], strides = [1, 1]} : vector<65x32xf32> to vector<1x32xf32>
    %172 = vector.broadcast %171 : vector<1x32xf32> to vector<16x32xf32>
    %173 = arith.addf %170, %172 : vector<16x32xf32>
    %174 = arith.addf %157, %173 : vector<16x32xf32>
    %c3_77 = arith.constant 3 : index
    %c0_78 = arith.constant 0 : index
    %c0_79 = arith.constant 0 : index
    %175 = vector.load %arg5[%c3_77, %c0_78, %c0_79] : memref<10x1x32xf32, #tpu.memory_space<vmem>>, vector<1x1x32xf32>
    %176 = vector.shape_cast %175 : vector<1x1x32xf32> to vector<1x32xf32>
    %c4_80 = arith.constant 4 : index
    %c0_81 = arith.constant 0 : index
    %c0_82 = arith.constant 0 : index
    %177 = vector.load %arg5[%c4_80, %c0_81, %c0_82] : memref<10x1x32xf32, #tpu.memory_space<vmem>>, vector<1x1x32xf32>
    %178 = vector.shape_cast %177 : vector<1x1x32xf32> to vector<1x32xf32>
    %cst_83 = arith.constant dense<0.000000e+00> : vector<16xf32>
    %179 = vector.multi_reduction <add>, %174, %cst_83 [1] : vector<16x32xf32> to vector<16xf32>
    %180 = vector.shape_cast %179 : vector<16xf32> to vector<16x1xf32>
    %cst_84 = arith.constant 3.200000e+01 : f32
    %181 = vector.broadcast %cst_84 : f32 to vector<16x1xf32>
    %182 = arith.divf %180, %181 : vector<16x1xf32>
    %183 = vector.broadcast %182 : vector<16x1xf32> to vector<16x32xf32>
    %184 = arith.subf %174, %183 : vector<16x32xf32>
    %185 = arith.mulf %184, %184 : vector<16x32xf32>
    %cst_85 = arith.constant dense<0.000000e+00> : vector<16xf32>
    %186 = vector.multi_reduction <add>, %185, %cst_85 [1] : vector<16x32xf32> to vector<16xf32>
    %187 = vector.shape_cast %186 : vector<16xf32> to vector<16x1xf32>
    %cst_86 = arith.constant 3.200000e+01 : f32
    %188 = vector.broadcast %cst_86 : f32 to vector<16x1xf32>
    %189 = arith.divf %187, %188 : vector<16x1xf32>
    %190 = vector.broadcast %182 : vector<16x1xf32> to vector<16x32xf32>
    %191 = arith.subf %174, %190 : vector<16x32xf32>
    %cst_87 = arith.constant 9.99999974E-6 : f32
    %192 = vector.broadcast %cst_87 : f32 to vector<16x1xf32>
    %193 = arith.addf %189, %192 : vector<16x1xf32>
    %194 = math.rsqrt %193 : vector<16x1xf32>
    %195 = vector.broadcast %194 : vector<16x1xf32> to vector<16x32xf32>
    %196 = arith.mulf %191, %195 : vector<16x32xf32>
    %197 = vector.broadcast %176 : vector<1x32xf32> to vector<16x32xf32>
    %198 = arith.mulf %196, %197 : vector<16x32xf32>
    %199 = vector.broadcast %178 : vector<1x32xf32> to vector<16x32xf32>
    %200 = arith.addf %198, %199 : vector<16x32xf32>
    %cst_88 = arith.constant 0.000000e+00 : f32
    %201 = vector.broadcast %cst_88 : f32 to vector<16x32xf32>
    %c6 = arith.constant 6 : index
    %c0_89 = arith.constant 0 : index
    %c0_90 = arith.constant 0 : index
    %202 = vector.load %arg3[%c6, %c0_89, %c0_90] : memref<12x33x16xf32, #tpu.memory_space<vmem>>, vector<1x33x16xf32>
    %203 = vector.shape_cast %202 : vector<1x33x16xf32> to vector<33x16xf32>
    %204 = vector.extract_strided_slice %203 {offsets = [0, 0], sizes = [32, 16], strides = [1, 1]} : vector<33x16xf32> to vector<32x16xf32>
    %cst_91 = arith.constant dense<0.000000e+00> : vector<16x16xf32>
    %205 = tpu.matmul %200, %204, %cst_91 {dimension_numbers = #tpu.dot_dimension_numbers<[1], [0], [0], [1], [0, 0, 1, 1], [], []>} : vector<16x32xf32>, vector<32x16xf32>, vector<16x16xf32> -> vector<16x16xf32>
    %206 = vector.extract_strided_slice %203 {offsets = [32, 0], sizes = [1, 16], strides = [1, 1]} : vector<33x16xf32> to vector<1x16xf32>
    %207 = vector.broadcast %206 : vector<1x16xf32> to vector<16x16xf32>
    %208 = arith.addf %205, %207 : vector<16x16xf32>
    %c8 = arith.constant 8 : index
    %c0_92 = arith.constant 0 : index
    %c0_93 = arith.constant 0 : index
    %209 = vector.load %arg3[%c8, %c0_92, %c0_93] : memref<12x33x16xf32, #tpu.memory_space<vmem>>, vector<1x33x16xf32>
    %210 = vector.shape_cast %209 : vector<1x33x16xf32> to vector<33x16xf32>
    %211 = vector.extract_strided_slice %210 {offsets = [0, 0], sizes = [32, 16], strides = [1, 1]} : vector<33x16xf32> to vector<32x16xf32>
    %cst_94 = arith.constant dense<0.000000e+00> : vector<16x16xf32>
    %212 = tpu.matmul %200, %211, %cst_94 {dimension_numbers = #tpu.dot_dimension_numbers<[1], [0], [0], [1], [0, 0, 1, 1], [], []>} : vector<16x32xf32>, vector<32x16xf32>, vector<16x16xf32> -> vector<16x16xf32>
    %213 = vector.extract_strided_slice %210 {offsets = [32, 0], sizes = [1, 16], strides = [1, 1]} : vector<33x16xf32> to vector<1x16xf32>
    %214 = vector.broadcast %213 : vector<1x16xf32> to vector<16x16xf32>
    %215 = arith.addf %212, %214 : vector<16x16xf32>
    %c10 = arith.constant 10 : index
    %c0_95 = arith.constant 0 : index
    %c0_96 = arith.constant 0 : index
    %216 = vector.load %arg3[%c10, %c0_95, %c0_96] : memref<12x33x16xf32, #tpu.memory_space<vmem>>, vector<1x33x16xf32>
    %217 = vector.shape_cast %216 : vector<1x33x16xf32> to vector<33x16xf32>
    %218 = vector.extract_strided_slice %217 {offsets = [0, 0], sizes = [32, 16], strides = [1, 1]} : vector<33x16xf32> to vector<32x16xf32>
    %cst_97 = arith.constant dense<0.000000e+00> : vector<16x16xf32>
    %219 = tpu.matmul %200, %218, %cst_97 {dimension_numbers = #tpu.dot_dimension_numbers<[1], [0], [0], [1], [0, 0, 1, 1], [], []>} : vector<16x32xf32>, vector<32x16xf32>, vector<16x16xf32> -> vector<16x16xf32>
    %220 = vector.extract_strided_slice %217 {offsets = [32, 0], sizes = [1, 16], strides = [1, 1]} : vector<33x16xf32> to vector<1x16xf32>
    %221 = vector.broadcast %220 : vector<1x16xf32> to vector<16x16xf32>
    %222 = arith.addf %219, %221 : vector<16x16xf32>
    %cst_98 = arith.constant dense<0.000000e+00> : vector<16x16xf32>
    %223 = tpu.matmul %208, %215, %cst_98 {dimension_numbers = #tpu.dot_dimension_numbers<[1], [1], [0], [0], [0, 0, 1, 0], [], []>} : vector<16x16xf32>, vector<16x16xf32>, vector<16x16xf32> -> vector<16x16xf32>
    %cst_99 = arith.constant 2.500000e-01 : f32
    %224 = vector.broadcast %cst_99 : f32 to vector<16x16xf32>
    %225 = arith.mulf %223, %224 : vector<16x16xf32>
    %cst_100 = arith.constant -1.000000e+30 : f32
    %226 = vector.broadcast %cst_100 : f32 to vector<16x16xf32>
    %227 = arith.select %34, %225, %226 : vector<16x16xi1>, vector<16x16xf32>
    %cst_101 = arith.constant dense<0xFF800000> : vector<16xf32>
    %228 = vector.multi_reduction <maximumf>, %227, %cst_101 [1] : vector<16x16xf32> to vector<16xf32>
    %229 = vector.shape_cast %228 : vector<16xf32> to vector<16x1xf32>
    %230 = vector.broadcast %229 : vector<16x1xf32> to vector<16x16xf32>
    %231 = arith.subf %227, %230 : vector<16x16xf32>
    %232 = math.exp %231 : vector<16x16xf32>
    %cst_102 = arith.constant dense<0.000000e+00> : vector<16xf32>
    %233 = vector.multi_reduction <add>, %232, %cst_102 [1] : vector<16x16xf32> to vector<16xf32>
    %234 = vector.shape_cast %233 : vector<16xf32> to vector<16x1xf32>
    %cst_103 = arith.constant dense<0.000000e+00> : vector<16x16xf32>
    %235 = tpu.matmul %232, %222, %cst_103 {dimension_numbers = #tpu.dot_dimension_numbers<[1], [0], [0], [1], [0, 0, 1, 1], [], []>} : vector<16x16xf32>, vector<16x16xf32>, vector<16x16xf32> -> vector<16x16xf32>
    %236 = tpu.reciprocal %234 {approx = true} : vector<16x1xf32> -> vector<16x1xf32>
    %237 = vector.broadcast %236 : vector<16x1xf32> to vector<16x16xf32>
    %238 = arith.mulf %235, %237 : vector<16x16xf32>
    %c2_104 = arith.constant 2 : index
    %c0_105 = arith.constant 0 : index
    %c0_106 = arith.constant 0 : index
    %239 = vector.load %arg4[%c2_104, %c0_105, %c0_106] : memref<4x16x32xf32, #tpu.memory_space<vmem>>, vector<1x16x32xf32>
    %240 = vector.shape_cast %239 : vector<1x16x32xf32> to vector<16x32xf32>
    %cst_107 = arith.constant dense<0.000000e+00> : vector<16x32xf32>
    %241 = tpu.matmul %238, %240, %cst_107 {dimension_numbers = #tpu.dot_dimension_numbers<[1], [0], [0], [1], [0, 0, 1, 1], [], []>} : vector<16x16xf32>, vector<16x32xf32>, vector<16x32xf32> -> vector<16x32xf32>
    %242 = arith.addf %201, %241 : vector<16x32xf32>
    %c7 = arith.constant 7 : index
    %c0_108 = arith.constant 0 : index
    %c0_109 = arith.constant 0 : index
    %243 = vector.load %arg3[%c7, %c0_108, %c0_109] : memref<12x33x16xf32, #tpu.memory_space<vmem>>, vector<1x33x16xf32>
    %244 = vector.shape_cast %243 : vector<1x33x16xf32> to vector<33x16xf32>
    %245 = vector.extract_strided_slice %244 {offsets = [0, 0], sizes = [32, 16], strides = [1, 1]} : vector<33x16xf32> to vector<32x16xf32>
    %cst_110 = arith.constant dense<0.000000e+00> : vector<16x16xf32>
    %246 = tpu.matmul %200, %245, %cst_110 {dimension_numbers = #tpu.dot_dimension_numbers<[1], [0], [0], [1], [0, 0, 1, 1], [], []>} : vector<16x32xf32>, vector<32x16xf32>, vector<16x16xf32> -> vector<16x16xf32>
    %247 = vector.extract_strided_slice %244 {offsets = [32, 0], sizes = [1, 16], strides = [1, 1]} : vector<33x16xf32> to vector<1x16xf32>
    %248 = vector.broadcast %247 : vector<1x16xf32> to vector<16x16xf32>
    %249 = arith.addf %246, %248 : vector<16x16xf32>
    %c9 = arith.constant 9 : index
    %c0_111 = arith.constant 0 : index
    %c0_112 = arith.constant 0 : index
    %250 = vector.load %arg3[%c9, %c0_111, %c0_112] : memref<12x33x16xf32, #tpu.memory_space<vmem>>, vector<1x33x16xf32>
    %251 = vector.shape_cast %250 : vector<1x33x16xf32> to vector<33x16xf32>
    %252 = vector.extract_strided_slice %251 {offsets = [0, 0], sizes = [32, 16], strides = [1, 1]} : vector<33x16xf32> to vector<32x16xf32>
    %cst_113 = arith.constant dense<0.000000e+00> : vector<16x16xf32>
    %253 = tpu.matmul %200, %252, %cst_113 {dimension_numbers = #tpu.dot_dimension_numbers<[1], [0], [0], [1], [0, 0, 1, 1], [], []>} : vector<16x32xf32>, vector<32x16xf32>, vector<16x16xf32> -> vector<16x16xf32>
    %254 = vector.extract_strided_slice %251 {offsets = [32, 0], sizes = [1, 16], strides = [1, 1]} : vector<33x16xf32> to vector<1x16xf32>
    %255 = vector.broadcast %254 : vector<1x16xf32> to vector<16x16xf32>
    %256 = arith.addf %253, %255 : vector<16x16xf32>
    %c11 = arith.constant 11 : index
    %c0_114 = arith.constant 0 : index
    %c0_115 = arith.constant 0 : index
    %257 = vector.load %arg3[%c11, %c0_114, %c0_115] : memref<12x33x16xf32, #tpu.memory_space<vmem>>, vector<1x33x16xf32>
    %258 = vector.shape_cast %257 : vector<1x33x16xf32> to vector<33x16xf32>
    %259 = vector.extract_strided_slice %258 {offsets = [0, 0], sizes = [32, 16], strides = [1, 1]} : vector<33x16xf32> to vector<32x16xf32>
    %cst_116 = arith.constant dense<0.000000e+00> : vector<16x16xf32>
    %260 = tpu.matmul %200, %259, %cst_116 {dimension_numbers = #tpu.dot_dimension_numbers<[1], [0], [0], [1], [0, 0, 1, 1], [], []>} : vector<16x32xf32>, vector<32x16xf32>, vector<16x16xf32> -> vector<16x16xf32>
    %261 = vector.extract_strided_slice %258 {offsets = [32, 0], sizes = [1, 16], strides = [1, 1]} : vector<33x16xf32> to vector<1x16xf32>
    %262 = vector.broadcast %261 : vector<1x16xf32> to vector<16x16xf32>
    %263 = arith.addf %260, %262 : vector<16x16xf32>
    %cst_117 = arith.constant dense<0.000000e+00> : vector<16x16xf32>
    %264 = tpu.matmul %249, %256, %cst_117 {dimension_numbers = #tpu.dot_dimension_numbers<[1], [1], [0], [0], [0, 0, 1, 0], [], []>} : vector<16x16xf32>, vector<16x16xf32>, vector<16x16xf32> -> vector<16x16xf32>
    %cst_118 = arith.constant 2.500000e-01 : f32
    %265 = vector.broadcast %cst_118 : f32 to vector<16x16xf32>
    %266 = arith.mulf %264, %265 : vector<16x16xf32>
    %cst_119 = arith.constant -1.000000e+30 : f32
    %267 = vector.broadcast %cst_119 : f32 to vector<16x16xf32>
    %268 = arith.select %34, %266, %267 : vector<16x16xi1>, vector<16x16xf32>
    %cst_120 = arith.constant dense<0xFF800000> : vector<16xf32>
    %269 = vector.multi_reduction <maximumf>, %268, %cst_120 [1] : vector<16x16xf32> to vector<16xf32>
    %270 = vector.shape_cast %269 : vector<16xf32> to vector<16x1xf32>
    %271 = vector.broadcast %270 : vector<16x1xf32> to vector<16x16xf32>
    %272 = arith.subf %268, %271 : vector<16x16xf32>
    %273 = math.exp %272 : vector<16x16xf32>
    %cst_121 = arith.constant dense<0.000000e+00> : vector<16xf32>
    %274 = vector.multi_reduction <add>, %273, %cst_121 [1] : vector<16x16xf32> to vector<16xf32>
    %275 = vector.shape_cast %274 : vector<16xf32> to vector<16x1xf32>
    %cst_122 = arith.constant dense<0.000000e+00> : vector<16x16xf32>
    %276 = tpu.matmul %273, %263, %cst_122 {dimension_numbers = #tpu.dot_dimension_numbers<[1], [0], [0], [1], [0, 0, 1, 1], [], []>} : vector<16x16xf32>, vector<16x16xf32>, vector<16x16xf32> -> vector<16x16xf32>
    %277 = tpu.reciprocal %275 {approx = true} : vector<16x1xf32> -> vector<16x1xf32>
    %278 = vector.broadcast %277 : vector<16x1xf32> to vector<16x16xf32>
    %279 = arith.mulf %276, %278 : vector<16x16xf32>
    %c3_123 = arith.constant 3 : index
    %c0_124 = arith.constant 0 : index
    %c0_125 = arith.constant 0 : index
    %280 = vector.load %arg4[%c3_123, %c0_124, %c0_125] : memref<4x16x32xf32, #tpu.memory_space<vmem>>, vector<1x16x32xf32>
    %281 = vector.shape_cast %280 : vector<1x16x32xf32> to vector<16x32xf32>
    %cst_126 = arith.constant dense<0.000000e+00> : vector<16x32xf32>
    %282 = tpu.matmul %279, %281, %cst_126 {dimension_numbers = #tpu.dot_dimension_numbers<[1], [0], [0], [1], [0, 0, 1, 1], [], []>} : vector<16x16xf32>, vector<16x32xf32>, vector<16x32xf32> -> vector<16x32xf32>
    %283 = arith.addf %242, %282 : vector<16x32xf32>
    %c5_127 = arith.constant 5 : index
    %c0_128 = arith.constant 0 : index
    %c0_129 = arith.constant 0 : index
    %284 = vector.load %arg5[%c5_127, %c0_128, %c0_129] : memref<10x1x32xf32, #tpu.memory_space<vmem>>, vector<1x1x32xf32>
    %285 = vector.shape_cast %284 : vector<1x1x32xf32> to vector<1x32xf32>
    %286 = vector.broadcast %285 : vector<1x32xf32> to vector<16x32xf32>
    %287 = arith.addf %283, %286 : vector<16x32xf32>
    %288 = arith.addf %200, %287 : vector<16x32xf32>
    %c6_130 = arith.constant 6 : index
    %c0_131 = arith.constant 0 : index
    %c0_132 = arith.constant 0 : index
    %289 = vector.load %arg5[%c6_130, %c0_131, %c0_132] : memref<10x1x32xf32, #tpu.memory_space<vmem>>, vector<1x1x32xf32>
    %290 = vector.shape_cast %289 : vector<1x1x32xf32> to vector<1x32xf32>
    %c7_133 = arith.constant 7 : index
    %c0_134 = arith.constant 0 : index
    %c0_135 = arith.constant 0 : index
    %291 = vector.load %arg5[%c7_133, %c0_134, %c0_135] : memref<10x1x32xf32, #tpu.memory_space<vmem>>, vector<1x1x32xf32>
    %292 = vector.shape_cast %291 : vector<1x1x32xf32> to vector<1x32xf32>
    %cst_136 = arith.constant dense<0.000000e+00> : vector<16xf32>
    %293 = vector.multi_reduction <add>, %288, %cst_136 [1] : vector<16x32xf32> to vector<16xf32>
    %294 = vector.shape_cast %293 : vector<16xf32> to vector<16x1xf32>
    %cst_137 = arith.constant 3.200000e+01 : f32
    %295 = vector.broadcast %cst_137 : f32 to vector<16x1xf32>
    %296 = arith.divf %294, %295 : vector<16x1xf32>
    %297 = vector.broadcast %296 : vector<16x1xf32> to vector<16x32xf32>
    %298 = arith.subf %288, %297 : vector<16x32xf32>
    %299 = arith.mulf %298, %298 : vector<16x32xf32>
    %cst_138 = arith.constant dense<0.000000e+00> : vector<16xf32>
    %300 = vector.multi_reduction <add>, %299, %cst_138 [1] : vector<16x32xf32> to vector<16xf32>
    %301 = vector.shape_cast %300 : vector<16xf32> to vector<16x1xf32>
    %cst_139 = arith.constant 3.200000e+01 : f32
    %302 = vector.broadcast %cst_139 : f32 to vector<16x1xf32>
    %303 = arith.divf %301, %302 : vector<16x1xf32>
    %304 = vector.broadcast %296 : vector<16x1xf32> to vector<16x32xf32>
    %305 = arith.subf %288, %304 : vector<16x32xf32>
    %cst_140 = arith.constant 9.99999974E-6 : f32
    %306 = vector.broadcast %cst_140 : f32 to vector<16x1xf32>
    %307 = arith.addf %303, %306 : vector<16x1xf32>
    %308 = math.rsqrt %307 : vector<16x1xf32>
    %309 = vector.broadcast %308 : vector<16x1xf32> to vector<16x32xf32>
    %310 = arith.mulf %305, %309 : vector<16x32xf32>
    %311 = vector.broadcast %290 : vector<1x32xf32> to vector<16x32xf32>
    %312 = arith.mulf %310, %311 : vector<16x32xf32>
    %313 = vector.broadcast %292 : vector<1x32xf32> to vector<16x32xf32>
    %314 = arith.addf %312, %313 : vector<16x32xf32>
    %c1_141 = arith.constant 1 : index
    %c0_142 = arith.constant 0 : index
    %c0_143 = arith.constant 0 : index
    %315 = vector.load %arg6[%c1_141, %c0_142, %c0_143] : memref<2x33x64xf32, #tpu.memory_space<vmem>>, vector<1x33x64xf32>
    %316 = vector.shape_cast %315 : vector<1x33x64xf32> to vector<33x64xf32>
    %317 = vector.extract_strided_slice %316 {offsets = [0, 0], sizes = [32, 64], strides = [1, 1]} : vector<33x64xf32> to vector<32x64xf32>
    %cst_144 = arith.constant dense<0.000000e+00> : vector<16x64xf32>
    %318 = tpu.matmul %314, %317, %cst_144 {dimension_numbers = #tpu.dot_dimension_numbers<[1], [0], [0], [1], [0, 0, 1, 1], [], []>} : vector<16x32xf32>, vector<32x64xf32>, vector<16x64xf32> -> vector<16x64xf32>
    %319 = vector.extract_strided_slice %316 {offsets = [32, 0], sizes = [1, 64], strides = [1, 1]} : vector<33x64xf32> to vector<1x64xf32>
    %320 = vector.broadcast %319 : vector<1x64xf32> to vector<16x64xf32>
    %321 = arith.addf %318, %320 : vector<16x64xf32>
    %cst_145 = arith.constant 0.000000e+00 : f32
    %322 = vector.broadcast %cst_145 : f32 to vector<16x64xf32>
    %323 = arith.maximumf %321, %322 : vector<16x64xf32>
    %c1_146 = arith.constant 1 : index
    %c0_147 = arith.constant 0 : index
    %c0_148 = arith.constant 0 : index
    %324 = vector.load %arg7[%c1_146, %c0_147, %c0_148] : memref<2x65x32xf32, #tpu.memory_space<vmem>>, vector<1x65x32xf32>
    %325 = vector.shape_cast %324 : vector<1x65x32xf32> to vector<65x32xf32>
    %326 = vector.extract_strided_slice %325 {offsets = [0, 0], sizes = [64, 32], strides = [1, 1]} : vector<65x32xf32> to vector<64x32xf32>
    %cst_149 = arith.constant dense<0.000000e+00> : vector<16x32xf32>
    %327 = tpu.matmul %323, %326, %cst_149 {dimension_numbers = #tpu.dot_dimension_numbers<[1], [0], [0], [1], [0, 0, 1, 1], [], []>} : vector<16x64xf32>, vector<64x32xf32>, vector<16x32xf32> -> vector<16x32xf32>
    %328 = vector.extract_strided_slice %325 {offsets = [64, 0], sizes = [1, 32], strides = [1, 1]} : vector<65x32xf32> to vector<1x32xf32>
    %329 = vector.broadcast %328 : vector<1x32xf32> to vector<16x32xf32>
    %330 = arith.addf %327, %329 : vector<16x32xf32>
    %331 = arith.addf %314, %330 : vector<16x32xf32>
    %c8_150 = arith.constant 8 : index
    %c0_151 = arith.constant 0 : index
    %c0_152 = arith.constant 0 : index
    %332 = vector.load %arg5[%c8_150, %c0_151, %c0_152] : memref<10x1x32xf32, #tpu.memory_space<vmem>>, vector<1x1x32xf32>
    %333 = vector.shape_cast %332 : vector<1x1x32xf32> to vector<1x32xf32>
    %c9_153 = arith.constant 9 : index
    %c0_154 = arith.constant 0 : index
    %c0_155 = arith.constant 0 : index
    %334 = vector.load %arg5[%c9_153, %c0_154, %c0_155] : memref<10x1x32xf32, #tpu.memory_space<vmem>>, vector<1x1x32xf32>
    %335 = vector.shape_cast %334 : vector<1x1x32xf32> to vector<1x32xf32>
    %cst_156 = arith.constant dense<0.000000e+00> : vector<16xf32>
    %336 = vector.multi_reduction <add>, %331, %cst_156 [1] : vector<16x32xf32> to vector<16xf32>
    %337 = vector.shape_cast %336 : vector<16xf32> to vector<16x1xf32>
    %cst_157 = arith.constant 3.200000e+01 : f32
    %338 = vector.broadcast %cst_157 : f32 to vector<16x1xf32>
    %339 = arith.divf %337, %338 : vector<16x1xf32>
    %340 = vector.broadcast %339 : vector<16x1xf32> to vector<16x32xf32>
    %341 = arith.subf %331, %340 : vector<16x32xf32>
    %342 = arith.mulf %341, %341 : vector<16x32xf32>
    %cst_158 = arith.constant dense<0.000000e+00> : vector<16xf32>
    %343 = vector.multi_reduction <add>, %342, %cst_158 [1] : vector<16x32xf32> to vector<16xf32>
    %344 = vector.shape_cast %343 : vector<16xf32> to vector<16x1xf32>
    %cst_159 = arith.constant 3.200000e+01 : f32
    %345 = vector.broadcast %cst_159 : f32 to vector<16x1xf32>
    %346 = arith.divf %344, %345 : vector<16x1xf32>
    %347 = vector.broadcast %339 : vector<16x1xf32> to vector<16x32xf32>
    %348 = arith.subf %331, %347 : vector<16x32xf32>
    %cst_160 = arith.constant 9.99999974E-6 : f32
    %349 = vector.broadcast %cst_160 : f32 to vector<16x1xf32>
    %350 = arith.addf %346, %349 : vector<16x1xf32>
    %351 = math.rsqrt %350 : vector<16x1xf32>
    %352 = vector.broadcast %351 : vector<16x1xf32> to vector<16x32xf32>
    %353 = arith.mulf %348, %352 : vector<16x32xf32>
    %354 = vector.broadcast %333 : vector<1x32xf32> to vector<16x32xf32>
    %355 = arith.mulf %353, %354 : vector<16x32xf32>
    %356 = vector.broadcast %335 : vector<1x32xf32> to vector<16x32xf32>
    %357 = arith.addf %355, %356 : vector<16x32xf32>
    %c0_161 = arith.constant 0 : index
    %c0_162 = arith.constant 0 : index
    %358 = vector.load %arg8[%c0_161, %c0_162] : memref<33x512xf32, #tpu.memory_space<vmem>>, vector<33x512xf32>
    %359 = vector.extract_strided_slice %358 {offsets = [0, 0], sizes = [32, 512], strides = [1, 1]} : vector<33x512xf32> to vector<32x512xf32>
    %cst_163 = arith.constant dense<0.000000e+00> : vector<16x512xf32>
    %360 = tpu.matmul %357, %359, %cst_163 {dimension_numbers = #tpu.dot_dimension_numbers<[1], [0], [0], [1], [0, 0, 1, 1], [], []>} : vector<16x32xf32>, vector<32x512xf32>, vector<16x512xf32> -> vector<16x512xf32>
    %361 = vector.extract_strided_slice %358 {offsets = [32, 0], sizes = [1, 512], strides = [1, 1]} : vector<33x512xf32> to vector<1x512xf32>
    %362 = vector.broadcast %361 : vector<1x512xf32> to vector<16x512xf32>
    %363 = arith.addf %360, %362 : vector<16x512xf32>
    %cst_164 = arith.constant 0.000000e+00 : f32
    %364 = vector.broadcast %cst_164 : f32 to vector<16x512xf32>
    %365 = arith.maximumf %363, %364 : vector<16x512xf32>
    %c0_165 = arith.constant 0 : index
    %c0_166 = arith.constant 0 : index
    %366 = vector.load %arg9[%c0_165, %c0_166] : memref<512x128xf32, #tpu.memory_space<vmem>>, vector<512x128xf32>
    %cst_167 = arith.constant dense<0.000000e+00> : vector<16x128xf32>
    %367 = tpu.matmul %365, %366, %cst_167 {dimension_numbers = #tpu.dot_dimension_numbers<[1], [0], [0], [1], [0, 0, 1, 1], [], []>} : vector<16x512xf32>, vector<512x128xf32>, vector<16x128xf32> -> vector<16x128xf32>
    %c0_168 = arith.constant 0 : index
    %c0_169 = arith.constant 0 : index
    %368 = vector.load %arg10[%c0_168, %c0_169] : memref<1x128xf32, #tpu.memory_space<vmem>>, vector<1x128xf32>
    %369 = vector.broadcast %368 : vector<1x128xf32> to vector<16x128xf32>
    %370 = arith.addf %367, %369 : vector<16x128xf32>
    %cst_170 = arith.constant 0.000000e+00 : f32
    %371 = vector.broadcast %cst_170 : f32 to vector<16x128xf32>
    %372 = arith.maximumf %370, %371 : vector<16x128xf32>
    %373 = math.absf %370 : vector<16x128xf32>
    %cst_171 = arith.constant 0.000000e+00 : f32
    %374 = vector.broadcast %cst_171 : f32 to vector<16x128xf32>
    %375 = arith.subf %374, %373 : vector<16x128xf32>
    %376 = math.exp %375 : vector<16x128xf32>
    %cst_172 = arith.constant 1.000000e+00 : f32
    %377 = vector.broadcast %cst_172 : f32 to vector<16x128xf32>
    %378 = arith.addf %377, %376 : vector<16x128xf32>
    %379 = math.log %378 : vector<16x128xf32>
    %380 = arith.addf %372, %379 : vector<16x128xf32>
    %381 = tpu.iota {dimensions = array<i32: 1>} : vector<16x128xi32>
    %c4_i32 = arith.constant 4 : i32
    %382 = vector.broadcast %c4_i32 : i32 to vector<16x128xi32>
    %383 = arith.cmpi sge, %381, %382 : vector<16x128xi32>
    %c8_i32 = arith.constant 8 : i32
    %384 = vector.broadcast %c8_i32 : i32 to vector<16x128xi32>
    %385 = arith.cmpi slt, %381, %384 : vector<16x128xi32>
    %386 = arith.andi %383, %385 : vector<16x128xi1>
    %387 = arith.select %386, %380, %370 : vector<16x128xi1>, vector<16x128xf32>
    %c0_173 = arith.constant 0 : index
    %c0_174 = arith.constant 0 : index
    %388 = vector.load %arg11[%c0_173, %c0_174] : memref<16x128xf32, #tpu.memory_space<vmem>>, vector<16x128xf32>
    tpu.vector_store %arg11[%c0_173, %c0_174], %387 {strides = array<i32>} : memref<16x128xf32, #tpu.memory_space<vmem>>, vector<16x128xf32>,
    return
  }
}

</mosaic_0001>

<bundles_post_ra>
// kernel: transformer_model_forward.1
= control target key start
LH: loop header
LB: loop body
LE: loop exit
PB: predicated region body
PF: predicated region fallthrough
CT: control target
= control target key end

     0   :  { %vm90_vm0 = vcmask 130048   ;;  %vm185_vm1 = vcmask 261120   ;;  %v38_v62 = vlaneseq  ;;  %vm1410_vm5 = vcmask 523264   ;;  %s5274_s2 = inlined_call_operand.vmem [shape: f32[17,32], index: 2, kind: input, shape index: {}]   ;;  %s5275_s0 = inlined_call_operand.vmem [shape: f32[16,16], index: 0, kind: input, shape index: {}]   ;;  %s5276_s3 = inlined_call_operand.vmem [shape: f32[12,33,16], index: 3, kind: input, shape index: {}]   ;;  %s5277_s1 = inlined_call_operand.vmem [shape: f32[16,32], index: 1, kind: input, shape index: {}]   ;;  %s5278_s4 = inlined_call_operand.vmem [shape: f32[4,16,32], index: 4, kind: input, shape index: {}]   ;;  %s5279_s5 = inlined_call_operand.vmem [shape: f32[10,1,32], index: 5, kind: input, shape index: {}]   ;;  %s5280_s6 = inlined_call_operand.vmem [shape: f32[2,33,64], index: 6, kind: input, shape index: {}]   ;;  %s5281_s7 = inlined_call_operand.vmem [shape: f32[2,65,32], index: 7, kind: input, shape index: {}]   ;;  %s5282_s8 = inlined_call_operand.vmem [shape: f32[33,512], index: 8, kind: input, shape index: {}]   ;;  %s5283_s9 = inlined_call_operand.vmem [shape: f32[512,128], index: 9, kind: input, shape index: {}]   ;;  %s5284_s10 = inlined_call_operand.vmem [shape: f32[1,128], index: 10, kind: input, shape index: {}]   ;;  %s5285_s11 = inlined_call_operand.vmem [shape: f32[16,128], index: 11, kind: output, shape index: {}]  }
   0x1   :  { %v83_v0 = vld [vmem:[%s5274_s2] sm:$0xff]  ;;  %v84_v1 = vld [vmem:[%s5274_s2 + $0x8] sm:$0xff]  ;;  %v3366_v7 = vld [vmem:[%s5276_s3 + $0x50] sm:$0xff] }
   0x2   :  { %v81_v2 = vld [vmem:[%s5275_s0] sm:$0xff]  ;;  %v4061_v3 = vpack.c.bf16 %v84_v1, %v83_v0  ;;  %v177_v5 = vld [vmem:[%s5276_s3 + $0x8] sm:$0xff]  ;;  %v3367_v8 = vld [vmem:[%s5276_s3 + $0x58] sm:$0xff]  ;;  %v39_v63 = vshrl.u32 %v38_v62, 7  ;;  %v4595_v0 = vand.u32 127, %v38_v62 }
   0x3   :  { %3782 = vmatprep.mubr.msk.f32.mxu0 %vm90_vm0, %v81_v2  ;;  %v176_v4 = vld [vmem:[%s5276_s3] sm:$0xff]  ;;  %v4073_v9 = vpack.c.bf16 %v3367_v8, %v3366_v7  ;;  %v82_v10 = vld [vmem:[%s5275_s0 + $0x8] sm:$0xff]  ;;  %v178_v11 = vld [vmem:[%s5276_s3 + $0x10] sm:$0xff] }
   0x4   :  { %v4065_v6 = vpack.c.bf16 %v177_v5, %v176_v4  ;;  %4062 = vmatprep.subr.bf16.mxu0 %v4061_v3  ;;  %v179_v12 = vld [vmem:[%s5276_s3 + $0x18] sm:$0xff]  ;;  %v3368_v14 = vld [vmem:[%s5276_s3 + $0x60] sm:$0xff]  ;;  %v3369_v15 = vld [vmem:[%s5276_s3 + $0x68] sm:$0xff]  ;;  %v40_v1 = vadd.s32 8, %v39_v63  ;;  %v45_v2 = vand.u32 1, %v39_v63  ;;  %vm3349_vm6 = vcmp.ge.s32.totalorder %v4595_v0, 4 }
   0x5   :  { %4064 = vmatpush3.bf16.msra.mxu0 %v4061_v3  ;;  %v4069_v13 = vpack.c.bf16 %v179_v12, %v178_v11  ;;  %v4077_v16 = vpack.c.bf16 %v3369_v15, %v3368_v14  ;;  %v3374_v17 = vld [vmem:[%s5276_s3 + $0xa0] sm:$0xff]  ;;  %v3375_v18 = vld [vmem:[%s5276_s3 + $0xa8] sm:$0xff]  ;;  %v3360_v20 = vld [vmem:[%s5274_s2 + $0x10] ss:$0 sm:$0xff]  ;;  %v71_v3 = vand.u32 1, %v4595_v0  ;;  %vm3350_vm7 = vcmp.lt.s32.totalorder %v4595_v0, 8 }
   0x6   :  { %4066 = vmatprep.subr.bf16.mxu1 %v4065_v6  ;;  %4074 = vmatprep.subr.bf16.mxu0 %v4073_v9  ;;  %v4081_v19 = vpack.c.bf16 %v3375_v18, %v3374_v17  ;;  %v172_v24 = vld [vmem:[%s5277_s1] sm:$0xff]  ;;  %v173_v25 = vld [vmem:[%s5277_s1 + $0x8] sm:$0xff]  ;;  %v3376_v27 = vld [vmem:[%s5276_s3 + $0xb0] sm:$0xff]  ;;  %v52_v4 = vand.u32 1, %v40_v1 }
   0x7   :  { %4068 = vmatpush3.bf16.msra.mxu1 %v4065_v6  ;;  %v3377_v28 = vld [vmem:[%s5276_s3 + $0xb8] sm:$0xff]  ;;  %v3371_v32 = vld [vmem:[%s5276_s3 + $0x70] ss:$0 sm:$0xff]  ;;  %v3363_v33 = vld [vmem:[%s5276_s3 + $0x20] ss:$0 sm:$0xff]  ;;  %vm4598_vm3 = vcmp.eq.s32.totalorder %v45_v2, %v71_v3 }
   0x8   :  { %3783 = vmatmul.mubr.msk.f32.vlgmr.msra.gmra.mrb[0].mxu0 %vm90_vm0, %v82_v10  ;;  %4070 = vmatprep.subr.bf16.mxu1 %v4069_v13  ;;  %v4085_v31 = vpack.c.bf16 %v3377_v28, %v3376_v27  ;;  %v3388_v39 = vld [vmem:[%s5276_s3 + $0x28] sm:$0xff]  ;;  %v3389_v40 = vld [vmem:[%s5276_s3 + $0x30] sm:$0xff]  ;;  %vm4556_vm2 = vmpackc.low %vm90_vm0, %vm90_vm0  ;;  %vm4602_vm4 = vcmp.eq.s32.totalorder %v52_v4, %v71_v3 }
   0x9   :  { %4076 = vmatpush3.bf16.msra.mxu0 %v4073_v9  ;;  %v4099_v45 = vpack.c.bf16 %v3389_v40, %v3388_v39  ;;  %v3379_v46 = vld [vmem:[%s5276_s3 + $0xc0] ss:$0 sm:$0xff]  ;;  %v3390_v50 = vld [vmem:[%s5276_s3 + $0x38] sm:$0xff]  ;;  %v3404_v56 = vld [vmem:[%s5276_s3 + $0xc8] sm:$0xff] }
   0xa   :  { %4078 = vmatprep.subr.bf16.mxu0 %v4077_v16  ;;  %v3391_v51 = vld [vmem:[%s5276_s3 + $0x40] sm:$0xff]  ;;  %v3405_v57 = vld [vmem:[%s5276_s3 + $0xd0] sm:$0xff]  ;;  %v3406_v59 = vld [vmem:[%s5276_s3 + $0xd8] sm:$0xff] }
   0xb   :  { %4072 = vmatpush3.bf16.msra.mxu1 %v4069_v13  ;;  %v4103_v55 = vpack.c.bf16 %v3391_v51, %v3390_v50  ;;  %v4115_v58 = vpack.c.bf16 %v3405_v57, %v3404_v56  ;;  %v3407_v60 = vld [vmem:[%s5276_s3 + $0xe0] sm:$0xff]  ;;  %v3393_v13 = vld [vmem:[%s5276_s3 + $0x48] ss:$0 sm:$0xff]  ;;  %vm3351_vm8 = vmand %vm3349_vm6, %vm3350_vm7 }
   0xc   :  { %4082 = vmatprep.subr.bf16.mxu1 %v4081_v19  ;;  %v4119_v61 = vpack.c.bf16 %v3407_v60, %v3406_v59 }
   0xd   :  { %4080 = vmatpush3.bf16.msra.mxu0 %v4077_v16 }
  0xdb   :  { %v3784_v21 = vpop.f32.mrb[0].mxu0 }
  0xdc   :  { %v169_v22 = vadd.f32 %v3784_v21, %v3360_v20  ;;  %v163_v23 = vpop.f32.mrb[1].mxu0 }
  0xdd   :  { %v164_v26 = vadd.f32 %v3360_v20, %v163_v23 }
  0xde   :  { %v4528_v30 = vadd.f32 %v173_v25, %v169_v22  ;;  %v3396_v25 = vld [vmem:[%s5276_s3 + $0x78] sm:$0xff] }
  0xdf   :  { %v4526_v29 = vadd.f32 %v172_v24, %v164_v26  ;;  %v3397_v26 = vld [vmem:[%s5276_s3 + $0x80] sm:$0xff] }
  0xe0   :  { %v4107_v27 = vpack.c.bf16 %v3397_v26, %v3396_v25 }
  0xe1   :  { %3793 = vmatprep.mubr.msk.f32.mxu1 %vm185_vm1, %v4526_v29  ;;  %3804 = vmatprep.mubr.msk.f32.mxu0 %vm185_vm1, %v4526_v29 }
  0xe2   :  { %3794 = vmatmul.mubr.msk.f32.vlgmr.msra.gmra.mrb[0].mxu1 %vm185_vm1, %v4528_v30  ;;  %3805 = vmatmul.mubr.msk.f32.vlgmr.msra.gmra.mrb[2].mxu0 %vm185_vm1, %v4528_v30 }
  0xe3   :  { %4084 = vmatpush3.bf16.msra.mxu1 %v4081_v19  ;;  %3815 = vmatprep.mubr.msk.f32.mxu1 %vm185_vm1, %v4526_v29  ;;  %v3409_v19 = vld [vmem:[%s5276_s3 + $0xe8] ss:$0 sm:$0xff] }
  0xe4   :  { %4086 = vmatprep.subr.bf16.mxu1 %v4085_v31 }
  0xe7   :  { %4088 = vmatpush3.bf16.msra.mxu1 %v4085_v31 }
  0xea   :  { %3816 = vmatmul.mubr.msk.f32.vlgmr.msra.gmra.mrb[2].mxu1 %vm185_vm1, %v4528_v30 }
 0x1b5   :  { %v3795_v34 = vpop.f32.mrb[0].mxu1  ;;  %v3806_v35 = vpop.f32.mrb[2].mxu0 }
 0x1b6   :  { %v349_v36 = vadd.f32 %v3806_v35, %v3371_v32  ;;  %v258_v37 = vpop.f32.mrb[1].mxu1  ;;  %v343_v38 = vpop.f32.mrb[3].mxu0  ;;  %v264_v53 = vadd.f32 %v3795_v34, %v3363_v33 }
 0x1b7   :  { %v259_v41 = vadd.f32 %v3363_v33, %v258_v37  ;;  %v344_v42 = vadd.f32 %v3371_v32, %v343_v38  ;;  %v3398_v37 = vld [vmem:[%s5276_s3 + $0x88] sm:$0xff]  ;;  %v3399_v38 = vld [vmem:[%s5276_s3 + $0x90] sm:$0xff] }
 0x1b8   :  { %v4111_v39 = vpack.c.bf16 %v3399_v38, %v3398_v37 }
 0x1b9   :  { %v4089_v44 = vpack.c.bf16 %v349_v36, %v344_v42  ;;  %3822 = vmatprep.mubr.msk.f32.mxu0 %vm90_vm0, %v259_v41 }
 0x1bb   :  { %4091 = vmatprep.subr.msk.bf16.mxu0 %vm4556_vm2, %v4089_v44 }
 0x1bc   :  { %4094 = vmatpush3.bf16.xpose.msk.msra.mxu0 %vm4556_vm2, %v4089_v44 }
 0x1bd   :  { %v3817_v47 = vpop.f32.mrb[2].mxu1  ;;  %4100 = vmatprep.subr.bf16.mxu0 %v4099_v45 }
 0x1be   :  { %v434_v48 = vadd.f32 %v3817_v47, %v3379_v46  ;;  %v428_v49 = vpop.f32.mrb[3].mxu1 }
 0x1bf   :  { %v429_v52 = vadd.f32 %v3379_v46, %v428_v49 }
 0x1c1   :  { %v4095_v54 = vpack.c.bf16 %v434_v48, %v429_v52 }
 0x1c3   :  { %4096 = vmatprep.subr.bf16.mxu1 %v4095_v54  ;;  %3823 = vmatmul.mubr.msk.f32.vlgmr.msra.gmra.mrb[4].mxu0 %vm90_vm0, %v264_v53 }
 0x1c4   :  { %4098 = vmatpush3.bf16.msra.mxu1 %v4095_v54  ;;  %4102 = vmatpush3.bf16.msra.mxu0 %v4099_v45  ;;  %v3401_v45 = vld [vmem:[%s5276_s3 + $0x98] ss:$0 sm:$0xff] }
 0x1c5   :  { %3840 = vmatprep.mubr.msk.f32.mxu0 %vm185_vm1, %v4526_v29  ;;  %4104 = vmatprep.subr.bf16.mxu0 %v4103_v55 }
 0x1c6   :  { %4108 = vmatprep.subr.bf16.mxu1 %v4107_v27 }
 0x1c8   :  { %4106 = vmatpush3.bf16.msra.mxu0 %v4103_v55 }
 0x1c9   :  { %4116 = vmatprep.subr.bf16.mxu0 %v4115_v58 }
 0x1cb   :  { %3841 = vmatmul.mubr.msk.f32.vlgmr.msra.gmra.mrb[6].mxu0 %vm185_vm1, %v4528_v30 }
 0x1cc   :  { %4118 = vmatpush3.bf16.msra.mxu0 %v4115_v58  ;;  %3862 = vmatprep.mubr.msk.f32.mxu0 %vm185_vm1, %v4526_v29 }
 0x1cd   :  { %4120 = vmatprep.subr.bf16.mxu0 %v4119_v61 }
 0x1d0   :  { %4122 = vmatpush3.bf16.msra.mxu0 %v4119_v61 }
 0x1d3   :  { %3863 = vmatmul.mubr.msk.f32.vlgmr.msra.gmra.mrb[8].mxu0 %vm185_vm1, %v4528_v30 }
 0x296   :  { %v3824_v5 = vpop.f32.mrb[4].mxu0 }
 0x297   :  { %v515_v6 = vpop.f32.mrb[5].mxu0  ;;  %v525_v8 = vmul.f32 0.25, %v3824_v5 }
 0x298   :  { %v524_v9 = vmul.f32 0.25, %v515_v6 }
 0x299   :  { %v527_v14 = vsel %vm4602_vm4, %v525_v8, -1e+30 }
 0x29a   :  { %v526_v11 = vsel %vm4598_vm3, %v524_v9, -1e+30  ;;  %v531_v18 = vsel %vm90_vm0, %v527_v14, -inf  ;;  %v3418_v9 = vld [vmem:[%s5278_s4 + $0x10] sm:$0xff] }
 0x29b   :  { %v528_v12 = vsel %vm90_vm0, %v526_v11, -inf }
 0x29c   :  { %529 = vmax.xlane.f32.xlu0 %v528_v12 }
 0x29e   :  { %v3842_v15 = vpop.f32.mrb[6].mxu0 }
 0x29f   :  { %v715_v16 = vadd.f32 %v3842_v15, %v3393_v13  ;;  %v709_v17 = vpop.f32.mrb[7].mxu0 }
 0x2a0   :  { %532 = vmax.xlane.f32.xlu0 %v531_v18  ;;  %v710_v41 = vadd.f32 %v3393_v13, %v709_v17  ;;  %v631_v13 = vld [vmem:[%s5278_s4] sm:$0xff] }
 0x2a6   :  { %v3864_v20 = vpop.f32.mrb[8].mxu0 }
 0x2a7   :  { %v885_v21 = vadd.f32 %v3864_v20, %v3409_v19  ;;  %v879_v22 = vpop.f32.mrb[9].mxu0 }
 0x2a8   :  { %v880_v23 = vadd.f32 %v3409_v19, %v879_v22 }
 0x2aa   :  { %v4129_v24 = vpack.c.bf16 %v885_v21, %v880_v23 }
 0x2ac   :  { %4130 = vmatprep.subr.bf16.mxu0 %v4129_v24 }
 0x2ad   :  { %4132 = vmatpush3.bf16.msra.mxu0 %v4129_v24 }
 0x329   :  { %v530_v28 = vpop.xlane.xlu0 %529 }
 0x32a   :  { %v534_v31 = vsub.f32 %v526_v11, %v530_v28  ;;  %v3419_v11 = vld [vmem:[%s5278_s4 + $0x18] sm:$0xff] }
 0x32b   :  { %v4133_v12 = vpack.c.bf16 %v3419_v11, %v3418_v9  ;;  %v3427_v11 = vld [vmem:[%s5279_s5 + $0x1] ss:$0 sm:$0xff] }
 0x32c   :  { %v536_v32 = vmul.f32 1.442695, %v534_v31 }
 0x32d   :  { %v533_v33 = vpop.xlane.xlu0 %532 }
 0x32e   :  { %4350 = vpow2.f32 %v536_v32  ;;  %v535_v34 = vsub.f32 %v527_v14, %v533_v33  ;;  %v632_v14 = vld [vmem:[%s5278_s4 + $0x8] sm:$0xff]  ;;  %v3424_v32 = vld [vmem:[%s5279_s5] ss:$0 sm:$0xff] }
 0x32f   :  { %v4137_v15 = vpack.c.bf16 %v632_v14, %v631_v13 }
 0x330   :  { %v538_v35 = vmul.f32 1.442695, %v535_v34 }
 0x332   :  { %4352 = vpow2.f32 %v538_v35 }
 0x338   :  { %v4351_v36 = vpop.eup %4350 }
 0x339   :  { %3829 = vmatprep.mubr.msk.f32.mxu1 %vm90_vm0, %v4351_v36  ;;  %v540_v5 = vsel %vm90_vm0, %v4351_v36, 0.0 }
 0x33c   :  { %v4353_v40 = vpop.eup %4352 }
 0x33d   :  { %3830 = vmatmul.mubr.msk.f32.vlgmr.msra.gmra.mrb[4].mxu1 %vm90_vm0, %v4353_v40  ;;  %v543_v8 = vsel %vm90_vm0, %v4353_v40, 0.0 }
 0x33e   :  { %4110 = vmatpush3.bf16.msra.mxu1 %v4107_v27  ;;  %3851 = vmatprep.mubr.msk.f32.mxu1 %vm185_vm1, %v4526_v29 }
 0x33f   :  { %4112 = vmatprep.subr.bf16.mxu1 %v4111_v39 }
 0x342   :  { %4114 = vmatpush3.bf16.msra.mxu1 %v4111_v39 }
 0x345   :  { %3852 = vmatmul.mubr.msk.f32.vlgmr.msra.gmra.mrb[6].mxu1 %vm185_vm1, %v4528_v30 }
 0x346   :  { %3869 = vmatprep.mubr.msk.f32.mxu1 %vm90_vm0, %v710_v41 }
 0x410   :  { %v4637_v42 = vpop.f32.mrb[4].mxu1 }
 0x411   :  { %v4639_v44 = vpop.f32.mrb[5].mxu1 }
 0x418   :  { %v3853_v46 = vpop.f32.mrb[6].mxu1 }
 0x419   :  { %v800_v47 = vadd.f32 %v3853_v46, %v3401_v45  ;;  %v794_v48 = vpop.f32.mrb[7].mxu1 }
 0x41a   :  { %v795_v49 = vadd.f32 %v3401_v45, %v794_v48 }
 0x41c   :  { %v4123_v50 = vpack.c.bf16 %v800_v47, %v795_v49 }
 0x41e   :  { %4125 = vmatprep.subr.msk.bf16.mxu1 %vm4556_vm2, %v4123_v50 }
 0x41f   :  { %4128 = vmatpush3.bf16.xpose.msk.msra.mxu1 %vm4556_vm2, %v4123_v50 }
 0x420   :  { %4134 = vmatprep.subr.bf16.mxu1 %v4133_v12 }
 0x426   :  { %3870 = vmatmul.mubr.msk.f32.vlgmr.msra.gmra.mrb[8].mxu1 %vm90_vm0, %v715_v16 }
 0x427   :  { %4136 = vmatpush3.bf16.msra.mxu1 %v4133_v12 }
 0x428   :  { %4138 = vmatprep.subr.bf16.mxu1 %v4137_v15 }
 0x4f9   :  { %v3871_v51 = vpop.f32.mrb[8].mxu1 }
 0x4fa   :  { %v966_v52 = vpop.f32.mrb[9].mxu1  ;;  %v976_v53 = vmul.f32 0.25, %v3871_v51  ;;  %v1306_v51 = vld [vmem:[%s5280_s6 + $0x8] sm:$0xff] }
 0x4fb   :  { %v975_v54 = vmul.f32 0.25, %v966_v52 }
 0x4fc   :  { %v978_v57 = vsel %vm4602_vm4, %v976_v53, -1e+30  ;;  %v1307_v53 = vld [vmem:[%s5280_s6 + $0x10] sm:$0xff] }
 0x4fd   :  { %v977_v55 = vsel %vm4598_vm3, %v975_v54, -1e+30  ;;  %v982_v58 = vsel %vm90_vm0, %v978_v57, -inf  ;;  %v1308_v54 = vld [vmem:[%s5280_s6 + $0x18] sm:$0xff] }
 0x4fe   :  { %v979_v56 = vsel %vm90_vm0, %v977_v55, -inf }
 0x4ff   :  { %980 = vmax.xlane.f32.xlu1 %v979_v56  ;;  %v1397_v56 = vld [vmem:[%s5281_s7] sm:$0xff] }
 0x503   :  { %983 = vmax.xlane.f32.xlu1 %v982_v58  ;;  %v1399_v58 = vld [vmem:[%s5281_s7 + $0x10] sm:$0xff] }
 0x58c   :  { %v981_v59 = vpop.xlane.xlu1 %980 }
 0x58d   :  { %v985_v60 = vsub.f32 %v977_v55, %v981_v59  ;;  %v4145_v55 = vpack.c.bf16 %v1308_v54, %v1307_v53  ;;  %v3455_v53 = vld [vmem:[%s5276_s3 + $0x190] sm:$0xff]  ;;  %v3456_v54 = vld [vmem:[%s5276_s3 + $0x198] sm:$0xff] }
 0x58f   :  { %v987_v61 = vmul.f32 1.442695, %v985_v60  ;;  %v1400_v60 = vld [vmem:[%s5281_s7 + $0x18] sm:$0xff] }
 0x590   :  { %v984_v62 = vpop.xlane.xlu1 %983 }
 0x591   :  { %4354 = vpow2.f32 %v987_v61  ;;  %v986_v63 = vsub.f32 %v978_v57, %v984_v62  ;;  %v1398_v57 = vld [vmem:[%s5281_s7 + $0x8] sm:$0xff]  ;;  %v4153_v61 = vpack.c.bf16 %v1400_v60, %v1399_v58  ;;  %v1401_v62 = vld [vmem:[%s5281_s7 + $0x20] sm:$0xff] }
 0x592   :  { %v4149_v59 = vpack.c.bf16 %v1398_v57, %v1397_v56  ;;  %v3441_v56 = vld [vmem:[%s5276_s3 + $0x100] sm:$0xff]  ;;  %v3442_v57 = vld [vmem:[%s5276_s3 + $0x108] sm:$0xff] }
 0x593   :  { %v989_v1 = vmul.f32 1.442695, %v986_v63  ;;  %v1402_v63 = vld [vmem:[%s5281_s7 + $0x28] sm:$0xff]  ;;  %v4169_v58 = vpack.c.bf16 %v3442_v57, %v3441_v56 }
 0x594   :  { %v3458_v60 = vld [vmem:[%s5276_s3 + $0x1a8] sm:$0xff] }
 0x595   :  { %4356 = vpow2.f32 %v989_v1  ;;  %v4157_v1 = vpack.c.bf16 %v1402_v63, %v1401_v62  ;;  %v3447_v62 = vld [vmem:[%s5276_s3 + $0x140] sm:$0xff]  ;;  %v3448_v63 = vld [vmem:[%s5276_s3 + $0x148] sm:$0xff] }
 0x59b   :  { %v4355_v2 = vpop.eup %4354 }
 0x59c   :  { %3876 = vmatprep.mubr.msk.f32.mxu0 %vm90_vm0, %v4355_v2  ;;  %v991_v3 = vsel %vm90_vm0, %v4355_v2, 0.0 }
 0x59d   :  { %992 = vadd.xlane.f32.xlu0 %v991_v3 }
 0x59f   :  { %v4357_v4 = vpop.eup %4356 }
 0x5a0   :  { %3877 = vmatmul.mubr.msk.f32.vlgmr.msra.gmra.mrb[10].mxu0 %vm90_vm0, %v4357_v4  ;;  %v994_v6 = vsel %vm90_vm0, %v4357_v4, 0.0 }
 0x5a1   :  { %541 = vadd.xlane.f32.xlu0 %v540_v5  ;;  %995 = vadd.xlane.f32.xlu1 %v994_v6 }
 0x5a5   :  { %544 = vadd.xlane.f32.xlu1 %v543_v8 }
 0x62a   :  { %v993_v16 = vpop.xlane.xlu0 %992 }
 0x62b   :  { %4358 = vrcp.f32 %v993_v16 }
 0x62e   :  { %v542_v17 = vpop.xlane.xlu0 %541  ;;  %v996_v18 = vpop.xlane.xlu1 %995 }
 0x62f   :  { %4360 = vrcp.f32 %v542_v17 }
 0x630   :  { %4362 = vrcp.f32 %v996_v18 }
 0x632   :  { %v545_v19 = vpop.xlane.xlu1 %544 }
 0x633   :  { %4364 = vrcp.f32 %v545_v19 }
 0x635   :  { %v4359_v20 = vpop.eup %4358 }
 0x639   :  { %v4361_v22 = vpop.eup %4360 }
 0x63a   :  { %v4363_v24 = vpop.eup %4362  ;;  %v629_v27 = vmul.f32 %v4361_v22, %v4639_v44 }
 0x63d   :  { %v4365_v28 = vpop.eup %4364 }
 0x63e   :  { %v630_v31 = vmul.f32 %v4365_v28, %v4637_v42 }
 0x673   :  { %v3878_v21 = vpop.f32.mrb[10].mxu0 }
 0x674   :  { %v1069_v23 = vpop.f32.mrb[11].mxu0  ;;  %v1081_v26 = vmul.f32 %v4363_v24, %v3878_v21  ;;  %v1404_v21 = vld [vmem:[%s5281_s7 + $0x38] sm:$0xff] }
 0x675   :  { %v1080_v25 = vmul.f32 %v4359_v20, %v1069_v23  ;;  %v1403_v20 = vld [vmem:[%s5281_s7 + $0x30] sm:$0xff]  ;;  %v3429_v23 = vld [vmem:[%s5280_s6 + $0x20] ss:$0 sm:$0xff] }
 0x676   :  { %v4161_v22 = vpack.c.bf16 %v1404_v21, %v1403_v20 }
 0x677   :  { %3883 = vmatprep.mubr.msk.f32.mxu1 %vm90_vm0, %v1080_v25 }
 0x678   :  { %3884 = vmatmul.mubr.msk.f32.vlgmr.msra.gmra.mrb[10].mxu1 %vm90_vm0, %v1081_v26 }
 0x679   :  { %4140 = vmatpush3.bf16.msra.mxu1 %v4137_v15  ;;  %3890 = vmatprep.mubr.msk.f32.mxu1 %vm90_vm0, %v629_v27  ;;  %v3428_v15 = vld [vmem:[%s5279_s5 + $0x2] ss:$0 sm:$0xff] }
 0x67a   :  { %4150 = vmatprep.subr.bf16.mxu1 %v4149_v59 }
 0x680   :  { %3891 = vmatmul.mubr.msk.f32.vlgmr.msra.gmra.mrb[10].mxu1 %vm90_vm0, %v630_v31 }
 0x681   :  { %4152 = vmatpush3.bf16.msra.mxu1 %v4149_v59  ;;  %v3457_v59 = vld [vmem:[%s5276_s3 + $0x1a0] sm:$0xff] }
 0x682   :  { %4154 = vmatprep.subr.bf16.mxu1 %v4153_v61 }
 0x685   :  { %4156 = vmatpush3.bf16.msra.mxu1 %v4153_v61  ;;  %v4185_v61 = vpack.c.bf16 %v3458_v60, %v3457_v59 }
 0x686   :  { %4158 = vmatprep.subr.bf16.mxu1 %v4157_v1 }
 0x689   :  { %4160 = vmatpush3.bf16.msra.mxu1 %v4157_v1  ;;  %v4173_v1 = vpack.c.bf16 %v3448_v63, %v3447_v62 }
 0x68a   :  { %4162 = vmatprep.subr.bf16.mxu1 %v4161_v22 }
 0x68d   :  { %4164 = vmatpush3.bf16.msra.mxu1 %v4161_v22 }
 0x753   :  { %v3892_v33 = vpop.f32.mrb[10].mxu1 }
 0x754   :  { %v1255_v34 = vadd.f32 %v3892_v33, %v3424_v32  ;;  %v1238_v35 = vpop.f32.mrb[11].mxu1 }
 0x755   :  { %v1254_v36 = vadd.f32 %v3424_v32, %v1238_v35  ;;  %v3432_v32 = vld [vmem:[%s5281_s7 + $0x40] ss:$0 sm:$0xff] }
 0x756   :  { %v1257_v37 = vadd.f32 %v1255_v34, %v4528_v30 }
 0x757   :  { %v1256_v38 = vadd.f32 %v1254_v36, %v4526_v29  ;;  %v1305_v29 = vld [vmem:[%s5280_s6] sm:$0xff] }
 0x758   :  { %v1265_v39 = vsel %vm185_vm1, %v1257_v37, 0.0  ;;  %v4141_v52 = vpack.c.bf16 %v1306_v51, %v1305_v29  ;;  %v3439_v29 = vld [vmem:[%s5276_s3 + $0xf0] sm:$0xff]  ;;  %v3440_v51 = vld [vmem:[%s5276_s3 + $0xf8] sm:$0xff] }
 0x759   :  { %1266 = vadd.xlane.f32.xlu1 %v1265_v39  ;;  %v1262_v40 = vsel %vm185_vm1, %v1256_v38, 0.0 }
 0x75a   :  { %1263 = vadd.xlane.f32.xlu0 %v1262_v40  ;;  %4142 = vmatprep.subr.bf16.mxu0 %v4141_v52 }
 0x75b   :  { %4144 = vmatpush3.bf16.msra.mxu0 %v4141_v52  ;;  %v4165_v52 = vpack.c.bf16 %v3440_v51, %v3439_v29  ;;  %v3489_v29 = vld [vmem:[%s5276_s3 + $0x1c8] sm:$0xff]  ;;  %v3490_v51 = vld [vmem:[%s5276_s3 + $0x1d0] sm:$0xff] }
 0x75c   :  { %4146 = vmatprep.subr.bf16.mxu0 %v4145_v55 }
 0x75f   :  { %4148 = vmatpush3.bf16.msra.mxu0 %v4145_v55  ;;  %v4181_v55 = vpack.c.bf16 %v3456_v54, %v3455_v53 }
 0x760   :  { %4166 = vmatprep.subr.bf16.mxu0 %v4165_v52 }
 0x761   :  { %4182 = vmatprep.subr.bf16.mxu1 %v4181_v55 }
 0x7e6   :  { %v1267_v41 = vpop.xlane.xlu1 %1266 }
 0x7e7   :  { %v1270_v42 = vmul.f32 0.03125, %v1267_v41  ;;  %v1264_v44 = vpop.xlane.xlu0 %1263 }
 0x7e8   :  { %v1269_v45 = vmul.f32 0.03125, %v1264_v44 }
 0x7e9   :  { %v1272_v46 = vsub.f32 %v1257_v37, %v1270_v42 }
 0x7ea   :  { %v1271_v47 = vsub.f32 %v1256_v38, %v1269_v45 }
 0x7eb   :  { %v1274_v48 = vmul.f32 %v1272_v46, %v1272_v46 }
 0x7ec   :  { %v1273_v49 = vmul.f32 %v1271_v47, %v1271_v47 }
 0x7ed   :  { %v1278_v50 = vsel %vm185_vm1, %v1274_v48, 0.0 }
 0x7ee   :  { %1279 = vadd.xlane.f32.xlu1 %v1278_v50  ;;  %v1275_v30 = vsel %vm185_vm1, %v1273_v49, 0.0 }
 0x7ef   :  { %1276 = vadd.xlane.f32.xlu0 %v1275_v30 }
 0x87b   :  { %v1280_v2 = vpop.xlane.xlu1 %1279 }
 0x87c   :  { %v1282_v3 = vmul.f32 0.03125, %v1280_v2  ;;  %v1277_v4 = vpop.xlane.xlu0 %1276 }
 0x87d   :  { %v1281_v5 = vmul.f32 0.03125, %v1277_v4 }
 0x87e   :  { %v1284_v6 = vadd.f32 1e-05, %v1282_v3 }
 0x87f   :  { %v1283_v8 = vadd.f32 1e-05, %v1281_v5 }
 0x880   :  { %4366 = vrsqrt.f32 %v1284_v6 }
 0x881   :  { %4368 = vrsqrt.f32 %v1283_v8 }
 0x88a   :  { %v4367_v9 = vpop.eup %4366 }
 0x88b   :  { %v4369_v12 = vpop.eup %4368  ;;  %v1288_v13 = vmul.f32 %v4367_v9, %v1272_v46 }
 0x88c   :  { %v1287_v14 = vmul.f32 %v4369_v12, %v1271_v47 }
 0x88d   :  { %v1296_v16 = vmul.f32 %v3427_v11, %v1288_v13 }
 0x88e   :  { %v1295_v17 = vmul.f32 %v3427_v11, %v1287_v14  ;;  %v3437_v11 = vld [vmem:[%s5279_s5 + $0x3] ss:$0 sm:$0xff] }
 0x88f   :  { %v1304_v19 = vadd.f32 %v3428_v15, %v1296_v16 }
 0x890   :  { %v1303_v18 = vadd.f32 %v3428_v15, %v1295_v17  ;;  %v3438_v15 = vld [vmem:[%s5279_s5 + $0x4] ss:$0 sm:$0xff] }
 0x892   :  { %3901 = vmatprep.mubr.msk.f32.mxu0 %vm185_vm1, %v1303_v18 }
 0x893   :  { %3902 = vmatmul.mubr.msk.f32.vlgmr.msra.gmra.mrb[12].mxu0 %vm185_vm1, %v1304_v19 }
 0x894   :  { %4168 = vmatpush3.bf16.msra.mxu0 %v4165_v52  ;;  %v4219_v52 = vpack.c.bf16 %v3490_v51, %v3489_v29 }
 0x895   :  { %4170 = vmatprep.subr.bf16.mxu0 %v4169_v58 }
 0x898   :  { %4172 = vmatpush3.bf16.msra.mxu0 %v4169_v58 }
 0x899   :  { %4174 = vmatprep.subr.bf16.mxu0 %v4173_v1 }
 0x966   :  { %v3903_v24 = vpop.f32.mrb[12].mxu0 }
 0x967   :  { %v1392_v25 = vadd.f32 %v3903_v24, %v3429_v23  ;;  %v1386_v26 = vpop.f32.mrb[13].mxu0  ;;  %v3444_v24 = vld [vmem:[%s5276_s3 + $0x110] ss:$0 sm:$0xff] }
 0x968   :  { %v1387_v27 = vadd.f32 %v3429_v23, %v1386_v26  ;;  %v3460_v23 = vld [vmem:[%s5276_s3 + $0x1b0] ss:$0 sm:$0xff] }
 0x969   :  { %v1396_v31 = vmax.f32 %v1392_v25, 0.0 }
 0x96a   :  { %v1395_v28 = vmax.f32 %v1387_v27, 0.0 }
 0x96c   :  { %3920 = vmatprep.mubr.msk.f32.mxu1 %vm1410_vm5, %v1395_v28 }
 0x96d   :  { %3921 = vmatmul.mubr.msk.f32.vlgmr.msra.gmra.mrb[12].mxu1 %vm1410_vm5, %v1396_v31 }
 0x96e   :  { %4184 = vmatpush3.bf16.msra.mxu1 %v4181_v55 }
 0x96f   :  { %4186 = vmatprep.subr.bf16.mxu1 %v4185_v61 }
 0x972   :  { %4188 = vmatpush3.bf16.msra.mxu1 %v4185_v61  ;;  %v3476_v61 = vld [vmem:[%s5276_s3 + $0x138] ss:$0 sm:$0xff] }
 0xa40   :  { %v3922_v33 = vpop.f32.mrb[12].mxu1 }
 0xa41   :  { %v1489_v34 = vadd.f32 %v3922_v33, %v3432_v32  ;;  %v1483_v35 = vpop.f32.mrb[13].mxu1 }
 0xa42   :  { %v1484_v36 = vadd.f32 %v3432_v32, %v1483_v35  ;;  %v3452_v35 = vld [vmem:[%s5276_s3 + $0x160] ss:$0 sm:$0xff] }
 0xa43   :  { %v1493_v37 = vadd.f32 %v1489_v34, %v1304_v19  ;;  %v3450_v19 = vld [vmem:[%s5276_s3 + $0x158] sm:$0xff] }
 0xa44   :  { %v1492_v38 = vadd.f32 %v1484_v36, %v1303_v18  ;;  %v3449_v18 = vld [vmem:[%s5276_s3 + $0x150] sm:$0xff] }
 0xa45   :  { %v1501_v39 = vsel %vm185_vm1, %v1493_v37, 0.0  ;;  %v4177_v22 = vpack.c.bf16 %v3450_v19, %v3449_v18  ;;  %v3481_v19 = vld [vmem:[%s5276_s3 + $0x178] sm:$0xff] }
 0xa46   :  { %1502 = vadd.xlane.f32.xlu1 %v1501_v39  ;;  %v1498_v40 = vsel %vm185_vm1, %v1492_v38, 0.0  ;;  %v3471_v39 = vld [vmem:[%s5276_s3 + $0x118] sm:$0xff] }
 0xa47   :  { %1499 = vadd.xlane.f32.xlu0 %v1498_v40  ;;  %v3472_v40 = vld [vmem:[%s5276_s3 + $0x120] sm:$0xff] }
 0xad3   :  { %v1503_v41 = vpop.xlane.xlu1 %1502 }
 0xad4   :  { %v1505_v42 = vmul.f32 0.03125, %v1503_v41  ;;  %v1500_v44 = vpop.xlane.xlu0 %1499 }
 0xad5   :  { %v1504_v45 = vmul.f32 0.03125, %v1500_v44  ;;  %v4199_v44 = vpack.c.bf16 %v3472_v40, %v3471_v39 }
 0xad6   :  { %v1507_v46 = vsub.f32 %v1493_v37, %v1505_v42 }
 0xad7   :  { %v1506_v47 = vsub.f32 %v1492_v38, %v1504_v45  ;;  %v3473_v45 = vld [vmem:[%s5276_s3 + $0x128] sm:$0xff] }
 0xad8   :  { %v1509_v48 = vmul.f32 %v1507_v46, %v1507_v46 }
 0xad9   :  { %v1508_v49 = vmul.f32 %v1506_v47, %v1506_v47 }
 0xada   :  { %v1513_v50 = vsel %vm185_vm1, %v1509_v48, 0.0 }
 0xadb   :  { %1514 = vadd.xlane.f32.xlu1 %v1513_v50  ;;  %v1510_v30 = vsel %vm185_vm1, %v1508_v49, 0.0  ;;  %v3487_v49 = vld [vmem:[%s5276_s3 + $0x1b8] sm:$0xff]  ;;  %v3488_v50 = vld [vmem:[%s5276_s3 + $0x1c0] sm:$0xff] }
 0xadc   :  { %1511 = vadd.xlane.f32.xlu0 %v1510_v30  ;;  %v4215_v30 = vpack.c.bf16 %v3488_v50, %v3487_v49 }
 0xb68   :  { %v1515_v2 = vpop.xlane.xlu1 %1514 }
 0xb69   :  { %v1517_v3 = vmul.f32 0.03125, %v1515_v2  ;;  %v1512_v4 = vpop.xlane.xlu0 %1511  ;;  %v3492_v2 = vld [vmem:[%s5276_s3 + $0x1d8] ss:$0 sm:$0xff] }
 0xb6a   :  { %v1516_v5 = vmul.f32 0.03125, %v1512_v4 }
 0xb6b   :  { %v1519_v6 = vadd.f32 1e-05, %v1517_v3 }
 0xb6c   :  { %v1518_v8 = vadd.f32 1e-05, %v1516_v5 }
 0xb6d   :  { %4370 = vrsqrt.f32 %v1519_v6 }
 0xb6e   :  { %4372 = vrsqrt.f32 %v1518_v8 }
 0xb77   :  { %v4371_v9 = vpop.eup %4370 }
 0xb78   :  { %v4373_v12 = vpop.eup %4372  ;;  %v1523_v13 = vmul.f32 %v4371_v9, %v1507_v46  ;;  %v3474_v46 = vld [vmem:[%s5276_s3 + $0x130] sm:$0xff]  ;;  %v3479_v9 = vld [vmem:[%s5276_s3 + $0x168] sm:$0xff] }
 0xb79   :  { %v1522_v14 = vmul.f32 %v4373_v12, %v1506_v47  ;;  %v4203_v48 = vpack.c.bf16 %v3474_v46, %v3473_v45 }
 0xb7a   :  { %v1531_v16 = vmul.f32 %v3437_v11, %v1523_v13 }
 0xb7b   :  { %v1530_v17 = vmul.f32 %v3437_v11, %v1522_v14  ;;  %v3480_v11 = vld [vmem:[%s5276_s3 + $0x170] sm:$0xff] }
 0xb7c   :  { %v4788_v21 = vadd.f32 %v3438_v15, %v1531_v16  ;;  %v4207_v12 = vpack.c.bf16 %v3480_v11, %v3479_v9 }
 0xb7d   :  { %v4786_v20 = vadd.f32 %v3438_v15, %v1530_v17 }
 0xb7f   :  { %3931 = vmatprep.mubr.msk.f32.mxu0 %vm185_vm1, %v4786_v20  ;;  %3953 = vmatprep.mubr.msk.f32.mxu1 %vm185_vm1, %v4786_v20 }
 0xb80   :  { %3932 = vmatmul.mubr.msk.f32.vlgmr.msra.gmra.mrb[14].mxu0 %vm185_vm1, %v4788_v21  ;;  %3954 = vmatmul.mubr.msk.f32.vlgmr.msra.gmra.mrb[14].mxu1 %vm185_vm1, %v4788_v21 }
 0xb81   :  { %4176 = vmatpush3.bf16.msra.mxu0 %v4173_v1  ;;  %3942 = vmatprep.mubr.msk.f32.mxu0 %vm185_vm1, %v4786_v20 }
 0xb82   :  { %4178 = vmatprep.subr.bf16.mxu0 %v4177_v22 }
 0xb85   :  { %4180 = vmatpush3.bf16.msra.mxu0 %v4177_v22  ;;  %v3482_v22 = vld [vmem:[%s5276_s3 + $0x180] sm:$0xff] }
 0xb88   :  { %3943 = vmatmul.mubr.msk.f32.vlgmr.msra.gmra.mrb[16].mxu0 %vm185_vm1, %v4788_v21 }
 0xc53   :  { %v3933_v25 = vpop.f32.mrb[14].mxu0  ;;  %v3955_v26 = vpop.f32.mrb[14].mxu1 }
 0xc54   :  { %v1798_v27 = vadd.f32 %v3955_v26, %v3460_v23  ;;  %v1622_v28 = vpop.f32.mrb[15].mxu0  ;;  %v1792_v31 = vpop.f32.mrb[15].mxu1  ;;  %v1628_v47 = vadd.f32 %v3933_v25, %v3444_v24 }
 0xc55   :  { %v1623_v32 = vadd.f32 %v3444_v24, %v1622_v28  ;;  %v1793_v33 = vadd.f32 %v3460_v23, %v1792_v31  ;;  %v4211_v24 = vpack.c.bf16 %v3482_v22, %v3481_v19  ;;  %v3484_v31 = vld [vmem:[%s5276_s3 + $0x188] ss:$0 sm:$0xff] }
 0xc57   :  { %v4195_v34 = vpack.c.bf16 %v1798_v27, %v1793_v33  ;;  %3960 = vmatprep.mubr.msk.f32.mxu0 %vm90_vm0, %v1623_v32 }
 0xc59   :  { %4196 = vmatprep.subr.bf16.mxu1 %v4195_v34 }
 0xc5a   :  { %4198 = vmatpush3.bf16.msra.mxu1 %v4195_v34 }
 0xc5b   :  { %v3944_v36 = vpop.f32.mrb[16].mxu0  ;;  %4208 = vmatprep.subr.bf16.mxu1 %v4207_v12 }
 0xc5c   :  { %v1713_v37 = vadd.f32 %v3944_v36, %v3452_v35  ;;  %v1707_v38 = vpop.f32.mrb[17].mxu0 }
 0xc5d   :  { %v1708_v41 = vadd.f32 %v3452_v35, %v1707_v38 }
 0xc5f   :  { %v4189_v42 = vpack.c.bf16 %v1713_v37, %v1708_v41 }
 0xc61   :  { %4191 = vmatprep.subr.msk.bf16.mxu0 %vm4556_vm2, %v4189_v42 }
 0xc62   :  { %4194 = vmatpush3.bf16.xpose.msk.msra.mxu0 %vm4556_vm2, %v4189_v42 }
 0xc63   :  { %4200 = vmatprep.subr.bf16.mxu0 %v4199_v44 }
 0xc69   :  { %3961 = vmatmul.mubr.msk.f32.vlgmr.msra.gmra.mrb[18].mxu0 %vm90_vm0, %v1628_v47 }
 0xc6a   :  { %4202 = vmatpush3.bf16.msra.mxu0 %v4199_v44  ;;  %3978 = vmatprep.mubr.msk.f32.mxu0 %vm185_vm1, %v4786_v20 }
 0xc6b   :  { %4204 = vmatprep.subr.bf16.mxu0 %v4203_v48 }
 0xc6e   :  { %4206 = vmatpush3.bf16.msra.mxu0 %v4203_v48 }
 0xc6f   :  { %4216 = vmatprep.subr.bf16.mxu0 %v4215_v30 }
 0xc71   :  { %3979 = vmatmul.mubr.msk.f32.vlgmr.msra.gmra.mrb[20].mxu0 %vm185_vm1, %v4788_v21 }
 0xc72   :  { %4218 = vmatpush3.bf16.msra.mxu0 %v4215_v30  ;;  %4000 = vmatprep.mubr.msk.f32.mxu0 %vm185_vm1, %v4786_v20 }
 0xc73   :  { %4220 = vmatprep.subr.bf16.mxu0 %v4219_v52 }
 0xc76   :  { %4222 = vmatpush3.bf16.msra.mxu0 %v4219_v52 }
 0xc79   :  { %4001 = vmatmul.mubr.msk.f32.vlgmr.msra.gmra.mrb[22].mxu0 %vm185_vm1, %v4788_v21 }
 0xd3c   :  { %v3962_v53 = vpop.f32.mrb[18].mxu0 }
 0xd3d   :  { %v1889_v54 = vmul.f32 0.25, %v3962_v53  ;;  %v1879_v55 = vpop.f32.mrb[19].mxu0  ;;  %v3501_v53 = vld [vmem:[%s5278_s4 + $0x30] sm:$0xff] }
 0xd3e   :  { %v1888_v56 = vmul.f32 0.25, %v1879_v55 }
 0xd3f   :  { %v1891_v57 = vsel %vm4602_vm4, %v1889_v54, -1e+30  ;;  %v3502_v54 = vld [vmem:[%s5278_s4 + $0x38] sm:$0xff] }
 0xd40   :  { %v1895_v58 = vsel %vm90_vm0, %v1891_v57, -inf  ;;  %v1890_v59 = vsel %vm4598_vm3, %v1888_v56, -1e+30  ;;  %v4233_v55 = vpack.c.bf16 %v3502_v54, %v3501_v53  ;;  %v3469_v56 = vld [vmem:[%s5278_s4 + $0x20] sm:$0xff] }
 0xd41   :  { %1896 = vmax.xlane.f32.xlu1 %v1895_v58  ;;  %v1892_v60 = vsel %vm90_vm0, %v1890_v59, -inf }
 0xd42   :  { %1893 = vmax.xlane.f32.xlu0 %v1892_v60 }
 0xd44   :  { %v3980_v62 = vpop.f32.mrb[20].mxu0 }
 0xd45   :  { %v2080_v63 = vadd.f32 %v3980_v62, %v3476_v61  ;;  %v2074_v1 = vpop.f32.mrb[21].mxu0 }
 0xd46   :  { %v2075_v26 = vadd.f32 %v3476_v61, %v2074_v1 }
 0xd4c   :  { %v4002_v3 = vpop.f32.mrb[22].mxu0 }
 0xd4d   :  { %v2250_v4 = vadd.f32 %v4002_v3, %v3492_v2  ;;  %v2244_v5 = vpop.f32.mrb[23].mxu0 }
 0xd4e   :  { %v2245_v6 = vadd.f32 %v3492_v2, %v2244_v5 }
 0xd50   :  { %v4229_v8 = vpack.c.bf16 %v2250_v4, %v2245_v6 }
 0xd52   :  { %4230 = vmatprep.subr.bf16.mxu0 %v4229_v8 }
 0xd53   :  { %4232 = vmatpush3.bf16.msra.mxu0 %v4229_v8 }
 0xdce   :  { %v1897_v13 = vpop.xlane.xlu1 %1896 }
 0xdcf   :  { %v1899_v14 = vsub.f32 %v1891_v57, %v1897_v13  ;;  %v1894_v15 = vpop.xlane.xlu0 %1893  ;;  %v3470_v57 = vld [vmem:[%s5278_s4 + $0x28] sm:$0xff] }
 0xdd0   :  { %v1898_v16 = vsub.f32 %v1890_v59, %v1894_v15  ;;  %v4237_v58 = vpack.c.bf16 %v3470_v57, %v3469_v56 }
 0xdd1   :  { %v1902_v17 = vmul.f32 1.442695, %v1899_v14 }
 0xdd2   :  { %v1900_v18 = vmul.f32 1.442695, %v1898_v16 }
 0xdd4   :  { %4374 = vpow2.f32 %v1900_v18 }
 0xdd5   :  { %4376 = vpow2.f32 %v1902_v17 }
 0xdde   :  { %v4375_v23 = vpop.eup %4374 }
 0xddf   :  { %v4377_v25 = vpop.eup %4376  ;;  %3967 = vmatprep.mubr.msk.f32.mxu1 %vm90_vm0, %v4375_v23  ;;  %v1904_v52 = vsel %vm90_vm0, %v4375_v23, 0.0 }
 0xde0   :  { %3968 = vmatmul.mubr.msk.f32.vlgmr.msra.gmra.mrb[16].mxu1 %vm90_vm0, %v4377_v25  ;;  %v1907_v51 = vsel %vm90_vm0, %v4377_v25, 0.0 }
 0xde1   :  { %4210 = vmatpush3.bf16.msra.mxu1 %v4207_v12  ;;  %3989 = vmatprep.mubr.msk.f32.mxu1 %vm185_vm1, %v4786_v20  ;;  %v3508_v12 = vld [vmem:[%s5279_s5 + $0x5] ss:$0 sm:$0xff] }
 0xde2   :  { %4212 = vmatprep.subr.bf16.mxu1 %v4211_v24 }
 0xde5   :  { %4214 = vmatpush3.bf16.msra.mxu1 %v4211_v24 }
 0xde8   :  { %3990 = vmatmul.mubr.msk.f32.vlgmr.msra.gmra.mrb[18].mxu1 %vm185_vm1, %v4788_v21 }
 0xde9   :  { %4007 = vmatprep.mubr.msk.f32.mxu1 %vm90_vm0, %v2075_v26 }
 0xeb3   :  { %v4880_v27 = vpop.f32.mrb[16].mxu1 }
 0xeb4   :  { %v4882_v28 = vpop.f32.mrb[17].mxu1 }
 0xebb   :  { %v3991_v32 = vpop.f32.mrb[18].mxu1 }
 0xebc   :  { %v2165_v33 = vadd.f32 %v3991_v32, %v3484_v31  ;;  %v2159_v34 = vpop.f32.mrb[19].mxu1 }
 0xebd   :  { %v2160_v35 = vadd.f32 %v3484_v31, %v2159_v34  ;;  %v3514_v34 = vld [vmem:[%s5280_s6 + $0x30] sm:$0xff] }
 0xebf   :  { %v4223_v36 = vpack.c.bf16 %v2165_v33, %v2160_v35 }
 0xec1   :  { %4225 = vmatprep.subr.msk.bf16.mxu1 %vm4556_vm2, %v4223_v36 }
 0xec2   :  { %4228 = vmatpush3.bf16.xpose.msk.msra.mxu1 %vm4556_vm2, %v4223_v36  ;;  %v3515_v36 = vld [vmem:[%s5280_s6 + $0x38] sm:$0xff] }
 0xec3   :  { %4234 = vmatprep.subr.bf16.mxu1 %v4233_v55 }
 0xec9   :  { %4008 = vmatmul.mubr.msk.f32.vlgmr.msra.gmra.mrb[20].mxu1 %vm90_vm0, %v2080_v63 }
 0xeca   :  { %4236 = vmatpush3.bf16.msra.mxu1 %v4233_v55  ;;  %v3512_v55 = vld [vmem:[%s5279_s5 + $0x7] ss:$0 sm:$0xff] }
 0xecb   :  { %4238 = vmatprep.subr.bf16.mxu1 %v4237_v58 }
 0xf9c   :  { %v4009_v37 = vpop.f32.mrb[20].mxu1 }
 0xf9d   :  { %v2341_v38 = vmul.f32 0.25, %v4009_v37  ;;  %v2331_v39 = vpop.f32.mrb[21].mxu1  ;;  %v3516_v37 = vld [vmem:[%s5280_s6 + $0x40] sm:$0xff] }
 0xf9e   :  { %v2340_v40 = vmul.f32 0.25, %v2331_v39  ;;  %v3521_v39 = vld [vmem:[%s5281_s7 + $0x48] sm:$0xff] }
 0xf9f   :  { %v2343_v41 = vsel %vm4602_vm4, %v2341_v38, -1e+30  ;;  %v4245_v38 = vpack.c.bf16 %v3516_v37, %v3515_v36  ;;  %v2915_v36 = vld [vmem:[%s5282_s8 + $0x48] sm:$0xff] }
 0xfa0   :  { %v2347_v42 = vsel %vm90_vm0, %v2343_v41, -inf  ;;  %v2342_v44 = vsel %vm4598_vm3, %v2340_v40, -1e+30  ;;  %v3522_v40 = vld [vmem:[%s5281_s7 + $0x50] sm:$0xff]  ;;  %v2919_v37 = vld [vmem:[%s5282_s8 + $0x68] sm:$0xff] }
 0xfa1   :  { %2348 = vmax.xlane.f32.xlu1 %v2347_v42  ;;  %v2344_v45 = vsel %vm90_vm0, %v2342_v44, -inf  ;;  %v4249_v42 = vpack.c.bf16 %v3522_v40, %v3521_v39  ;;  %v2914_v39 = vld [vmem:[%s5282_s8 + $0x40] sm:$0xff] }
 0xfa2   :  { %2345 = vmax.xlane.f32.xlu0 %v2344_v45  ;;  %v2918_v40 = vld [vmem:[%s5282_s8 + $0x60] sm:$0xff] }
0x102e   :  { %v2349_v43 = vpop.xlane.xlu1 %2348 }
0x102f   :  { %v2351_v46 = vsub.f32 %v2343_v41, %v2349_v43  ;;  %v2346_v47 = vpop.xlane.xlu0 %2345  ;;  %v3523_v41 = vld [vmem:[%s5281_s7 + $0x58] sm:$0xff]  ;;  %v3525_v43 = vld [vmem:[%s5281_s7 + $0x68] sm:$0xff] }
0x1030   :  { %v2350_v48 = vsub.f32 %v2342_v44, %v2346_v47  ;;  %v3524_v44 = vld [vmem:[%s5281_s7 + $0x60] sm:$0xff] }
0x1031   :  { %v2354_v49 = vmul.f32 1.442695, %v2351_v46  ;;  %v4253_v45 = vpack.c.bf16 %v3524_v44, %v3523_v41  ;;  %v3526_v46 = vld [vmem:[%s5281_s7 + $0x70] sm:$0xff]  ;;  %v4271_v41 = vpack.c.bf16 %v2918_v40, %v2914_v39  ;;  %v2913_v44 = vld [vmem:[%s5282_s8 + $0x38] sm:$0xff] }
0x1032   :  { %v2352_v50 = vmul.f32 1.442695, %v2350_v48  ;;  %v4257_v47 = vpack.c.bf16 %v3526_v46, %v3525_v43  ;;  %v3126_v46 = vld [vmem:[%s5283_s9 + $0x80] sm:$0xff] }
0x1033   :  { %4378 = vpow2.f32 %v2354_v49 }
0x1034   :  { %4380 = vpow2.f32 %v2352_v50 }
0x103d   :  { %v4379_v30 = vpop.eup %4378 }
0x103e   :  { %v4381_v10 = vpop.eup %4380  ;;  %v2359_v29 = vsel %vm90_vm0, %v4379_v30, 0.0 }
0x103f   :  { %2360 = vadd.xlane.f32.xlu1 %v2359_v29  ;;  %4014 = vmatprep.mubr.msk.f32.mxu0 %vm90_vm0, %v4381_v10  ;;  %v2356_v7 = vsel %vm90_vm0, %v4381_v10, 0.0 }
0x1040   :  { %4015 = vmatmul.mubr.msk.f32.vlgmr.msra.gmra.mrb[24].mxu0 %vm90_vm0, %v4379_v30  ;;  %2357 = vadd.xlane.f32.xlu0 %v2356_v7 }
0x1043   :  { %1908 = vadd.xlane.f32.xlu1 %v1907_v51  ;;  %v3511_v51 = vld [vmem:[%s5279_s5 + $0x6] ss:$0 sm:$0xff] }
0x1044   :  { %1905 = vadd.xlane.f32.xlu0 %v1904_v52 }
0x10cc   :  { %v2361_v61 = vpop.xlane.xlu1 %2360 }
0x10cd   :  { %v2358_v59 = vpop.xlane.xlu0 %2357 }
0x10ce   :  { %4382 = vrcp.f32 %v2358_v59 }
0x10d0   :  { %v1909_v62 = vpop.xlane.xlu1 %1908 }
0x10d1   :  { %v1906_v60 = vpop.xlane.xlu0 %1905 }
0x10d2   :  { %4384 = vrcp.f32 %v1906_v60  ;;  %v3527_v60 = vld [vmem:[%s5281_s7 + $0x78] sm:$0xff] }
0x10d3   :  { %4386 = vrcp.f32 %v2361_v61  ;;  %v3528_v61 = vld [vmem:[%s5281_s7 + $0x80] sm:$0xff] }
0x10d4   :  { %4388 = vrcp.f32 %v1909_v62  ;;  %v4261_v62 = vpack.c.bf16 %v3528_v61, %v3527_v60  ;;  %v3133_v60 = vld [vmem:[%s5283_s9 + $0xb8] sm:$0xff] }
0x10d8   :  { %v4383_v63 = vpop.eup %4382 }
0x10dc   :  { %v4385_v2 = vpop.eup %4384 }
0x10dd   :  { %v4387_v4 = vpop.eup %4386  ;;  %v1993_v8 = vmul.f32 %v4385_v2, %v4882_v28 }
0x10de   :  { %v4389_v9 = vpop.eup %4388 }
0x10df   :  { %v1994_v11 = vmul.f32 %v4389_v9, %v4880_v27 }
0x1113   :  { %v4016_v1 = vpop.f32.mrb[24].mxu0 }
0x1114   :  { %v2434_v3 = vpop.f32.mrb[25].mxu0  ;;  %v2446_v6 = vmul.f32 %v4387_v4, %v4016_v1 }
0x1115   :  { %v2445_v5 = vmul.f32 %v4383_v63, %v2434_v3  ;;  %v3518_v63 = vld [vmem:[%s5280_s6 + $0x48] ss:$0 sm:$0xff] }
0x1117   :  { %4021 = vmatprep.mubr.msk.f32.mxu1 %vm90_vm0, %v2445_v5 }
0x1118   :  { %4022 = vmatmul.mubr.msk.f32.vlgmr.msra.gmra.mrb[22].mxu1 %vm90_vm0, %v2446_v6 }
0x1119   :  { %4240 = vmatpush3.bf16.msra.mxu1 %v4237_v58  ;;  %4028 = vmatprep.mubr.msk.f32.mxu1 %vm90_vm0, %v1993_v8  ;;  %v3530_v8 = vld [vmem:[%s5281_s7 + $0x88] ss:$0 sm:$0xff] }
0x111a   :  { %4250 = vmatprep.subr.bf16.mxu1 %v4249_v42 }
0x1120   :  { %4029 = vmatmul.mubr.msk.f32.vlgmr.msra.gmra.mrb[22].mxu1 %vm90_vm0, %v1994_v11 }
0x1121   :  { %4252 = vmatpush3.bf16.msra.mxu1 %v4249_v42  ;;  %v2909_v42 = vld [vmem:[%s5282_s8 + $0x18] sm:$0xff] }
0x1122   :  { %4254 = vmatprep.subr.bf16.mxu1 %v4253_v45  ;;  %v4273_v43 = vpack.c.bf16 %v2913_v44, %v2909_v42 }
0x1125   :  { %4256 = vmatpush3.bf16.msra.mxu1 %v4253_v45  ;;  %v4406_v45 = vmov 0.0  }
0x1126   :  { %4258 = vmatprep.subr.bf16.mxu1 %v4257_v47 }
0x1129   :  { %4260 = vmatpush3.bf16.msra.mxu1 %v4257_v47  ;;  %v3127_v47 = vld [vmem:[%s5283_s9 + $0x88] sm:$0xff] }
0x112a   :  { %4262 = vmatprep.subr.bf16.mxu1 %v4261_v62 }
0x112d   :  { %4264 = vmatpush3.bf16.msra.mxu1 %v4261_v62 }
0x11f3   :  { %v4030_v13 = vpop.f32.mrb[22].mxu1 }
0x11f4   :  { %v2621_v14 = vadd.f32 %v4030_v13, %v3508_v12  ;;  %v2603_v15 = vpop.f32.mrb[23].mxu1 }
0x11f5   :  { %v2620_v16 = vadd.f32 %v3508_v12, %v2603_v15 }
0x11f6   :  { %v2623_v17 = vadd.f32 %v2621_v14, %v4788_v21 }
0x11f7   :  { %v2622_v18 = vadd.f32 %v2620_v16, %v4786_v20  ;;  %v3513_v20 = vld [vmem:[%s5280_s6 + $0x28] sm:$0xff] }
0x11f8   :  { %v2631_v19 = vsel %vm185_vm1, %v2623_v17, 0.0  ;;  %v4241_v35 = vpack.c.bf16 %v3514_v34, %v3513_v20  ;;  %v2906_v20 = vld [vmem:[%s5282_s8] sm:$0xff] }
0x11f9   :  { %2632 = vadd.xlane.f32.xlu1 %v2631_v19  ;;  %v2628_v22 = vsel %vm185_vm1, %v2622_v18, 0.0  ;;  %v2910_v34 = vld [vmem:[%s5282_s8 + $0x20] sm:$0xff] }
0x11fa   :  { %2629 = vadd.xlane.f32.xlu0 %v2628_v22  ;;  %4242 = vmatprep.subr.bf16.mxu0 %v4241_v35 }
0x11fb   :  { %4244 = vmatpush3.bf16.msra.mxu0 %v4241_v35  ;;  %v4267_v35 = vpack.c.bf16 %v2910_v34, %v2906_v20  ;;  %v2908_v34 = vld [vmem:[%s5282_s8 + $0x10] sm:$0xff] }
0x11fc   :  { %4246 = vmatprep.subr.bf16.mxu0 %v4245_v38 }
0x11ff   :  { %4248 = vmatpush3.bf16.msra.mxu0 %v4245_v38  ;;  %v4269_v38 = vpack.c.bf16 %v2919_v37, %v2915_v36  ;;  %v3536_v37 = vld [vmem:[%s5279_s5 + $0x9] ss:$0 sm:$0xff] }
0x1286   :  { %v2633_v23 = vpop.xlane.xlu1 %2632 }
0x1287   :  { %v2635_v24 = vmul.f32 0.03125, %v2633_v23  ;;  %v2630_v25 = vpop.xlane.xlu0 %2629 }
0x1288   :  { %v2634_v26 = vmul.f32 0.03125, %v2630_v25 }
0x1289   :  { %v2637_v27 = vsub.f32 %v2623_v17, %v2635_v24 }
0x128a   :  { %v2636_v28 = vsub.f32 %v2622_v18, %v2634_v26 }
0x128b   :  { %v2639_v31 = vmul.f32 %v2637_v27, %v2637_v27 }
0x128c   :  { %v2638_v32 = vmul.f32 %v2636_v28, %v2636_v28 }
0x128d   :  { %v2643_v33 = vsel %vm185_vm1, %v2639_v31, 0.0 }
0x128e   :  { %2644 = vadd.xlane.f32.xlu1 %v2643_v33  ;;  %v2640_v21 = vsel %vm185_vm1, %v2638_v32, 0.0  ;;  %v2907_v32 = vld [vmem:[%s5282_s8 + $0x8] sm:$0xff] }
0x128f   :  { %2641 = vadd.xlane.f32.xlu0 %v2640_v21  ;;  %v2911_v33 = vld [vmem:[%s5282_s8 + $0x28] sm:$0xff] }
0x1290   :  { %v4265_v21 = vpack.c.bf16 %v2911_v33, %v2907_v32 }
0x1292   :  { %4266 = vmatprep.subr.bf16.mxu0 %v4265_v21  ;;  %v3535_v21 = vld [vmem:[%s5279_s5 + $0x8] ss:$0 sm:$0xff] }
0x131b   :  { %v2645_v48 = vpop.xlane.xlu1 %2644 }
0x131c   :  { %v2647_v49 = vmul.f32 0.03125, %v2645_v48  ;;  %v2642_v50 = vpop.xlane.xlu0 %2641  ;;  %v3110_v48 = vld [vmem:[%s5283_s9] sm:$0xff] }
0x131d   :  { %v2646_v30 = vmul.f32 0.03125, %v2642_v50  ;;  %v3111_v50 = vld [vmem:[%s5283_s9 + $0x8] sm:$0xff] }
0x131e   :  { %v2649_v10 = vadd.f32 1e-05, %v2647_v49  ;;  %v4281_v49 = vpack.c.bf16 %v3127_v47, %v3126_v46  ;;  %v3158_v46 = vld [vmem:[%s5283_s9 + $0x180] sm:$0xff]  ;;  %v3159_v47 = vld [vmem:[%s5283_s9 + $0x188] sm:$0xff] }
0x131f   :  { %v2648_v29 = vadd.f32 1e-05, %v2646_v30  ;;  %v3128_v30 = vld [vmem:[%s5283_s9 + $0x90] sm:$0xff] }
0x1320   :  { %4390 = vrsqrt.f32 %v2649_v10  ;;  %v3129_v10 = vld [vmem:[%s5283_s9 + $0x98] sm:$0xff]  ;;  %4282 = vmatprep.subr.bf16.mxu1 %v4281_v49 }
0x1321   :  { %4392 = vrsqrt.f32 %v2648_v29  ;;  %v4283_v29 = vpack.c.bf16 %v3111_v50, %v3110_v48  ;;  %v4313_v50 = vpack.c.bf16 %v3159_v47, %v3158_v46 }
0x132a   :  { %v4391_v7 = vpop.eup %4390 }
0x132b   :  { %v4393_v52 = vpop.eup %4392  ;;  %v2653_v53 = vmul.f32 %v4391_v7, %v2637_v27  ;;  %v4285_v7 = vpack.c.bf16 %v3129_v10, %v3128_v30  ;;  %v3142_v30 = vld [vmem:[%s5283_s9 + $0x100] sm:$0xff]  ;;  %v3143_v10 = vld [vmem:[%s5283_s9 + $0x108] sm:$0xff] }
0x132c   :  { %v2652_v54 = vmul.f32 %v4393_v52, %v2636_v28  ;;  %v3113_v52 = vld [vmem:[%s5283_s9 + $0x18] sm:$0xff] }
0x132d   :  { %v2661_v56 = vmul.f32 %v3511_v51, %v2653_v53  ;;  %v3130_v53 = vld [vmem:[%s5283_s9 + $0xa0] sm:$0xff] }
0x132e   :  { %v2660_v57 = vmul.f32 %v3511_v51, %v2652_v54  ;;  %v3112_v51 = vld [vmem:[%s5283_s9 + $0x10] sm:$0xff]  ;;  %v3131_v54 = vld [vmem:[%s5283_s9 + $0xa8] sm:$0xff] }
0x132f   :  { %v2669_v59 = vadd.f32 %v3512_v55, %v2661_v56  ;;  %v4289_v56 = vpack.c.bf16 %v3131_v54, %v3130_v53  ;;  %v3144_v53 = vld [vmem:[%s5283_s9 + $0x110] sm:$0xff]  ;;  %v3145_v54 = vld [vmem:[%s5283_s9 + $0x118] sm:$0xff] }
0x1330   :  { %v2668_v58 = vadd.f32 %v3512_v55, %v2660_v57  ;;  %v4287_v55 = vpack.c.bf16 %v3113_v52, %v3112_v51  ;;  %v3114_v57 = vld [vmem:[%s5283_s9 + $0x20] sm:$0xff]  ;;  %v4315_v51 = vpack.c.bf16 %v3143_v10, %v3142_v30 }
0x1332   :  { %4039 = vmatprep.mubr.msk.f32.mxu0 %vm185_vm1, %v2668_v58 }
0x1333   :  { %4040 = vmatmul.mubr.msk.f32.vlgmr.msra.gmra.mrb[26].mxu0 %vm185_vm1, %v2669_v59 }
0x1334   :  { %4268 = vmatpush1.bf16.msra.mxu0 %v4267_v35  ;;  %3012 = vmatprep.mubr.f32.mxu0 %v4406_v45  ;;  %v2912_v35 = vld [vmem:[%s5282_s8 + $0x30] sm:$0xff] }
0x1335   :  { %4270 = vmatprep.subr.bf16.mxu0 %v4269_v38  ;;  %v2917_v38 = vld [vmem:[%s5282_s8 + $0x58] sm:$0xff]  ;;  %v4275_v40 = vpack.c.bf16 %v2912_v35, %v2908_v34  ;;  %v3154_v34 = vld [vmem:[%s5283_s9 + $0x160] sm:$0xff]  ;;  %v3155_v35 = vld [vmem:[%s5283_s9 + $0x168] sm:$0xff] }
0x1338   :  { %4272 = vmatpush1.bf16.msra.mxu0 %v4271_v41 }
0x1339   :  { %4274 = vmatprep.subr.bf16.mxu0 %v4273_v43  ;;  %v2920_v43 = vld [vmem:[%s5282_s8 + $0x70] sm:$0xff] }
0x1406   :  { %v4041_v1 = vpop.f32.mrb[26].mxu0 }
0x1407   :  { %v2758_v2 = vadd.f32 %v4041_v1, %v3518_v63  ;;  %v2752_v3 = vpop.f32.mrb[27].mxu0  ;;  %v3117_v1 = vld [vmem:[%s5283_s9 + $0x38] sm:$0xff] }
0x1408   :  { %v2753_v4 = vadd.f32 %v3518_v63, %v2752_v3  ;;  %v3116_v63 = vld [vmem:[%s5283_s9 + $0x30] sm:$0xff]  ;;  %v3135_v3 = vld [vmem:[%s5283_s9 + $0xc8] sm:$0xff] }
0x1409   :  { %v2762_v6 = vmax.f32 %v2758_v2, 0.0  ;;  %v3134_v2 = vld [vmem:[%s5283_s9 + $0xc0] sm:$0xff] }
0x140a   :  { %v2761_v5 = vmax.f32 %v2753_v4, 0.0  ;;  %v4295_v4 = vpack.c.bf16 %v3117_v1, %v3116_v63  ;;  %v3148_v1 = vld [vmem:[%s5283_s9 + $0x130] sm:$0xff] }
0x140c   :  { %4058 = vmatprep.mubr.msk.f32.mxu1 %vm1410_vm5, %v2761_v5  ;;  %v4297_v5 = vpack.c.bf16 %v3135_v3, %v3134_v2  ;;  %v3149_v2 = vld [vmem:[%s5283_s9 + $0x138] sm:$0xff]  ;;  %v3166_v3 = vld [vmem:[%s5283_s9 + $0x1c0] sm:$0xff] }
0x140d   :  { %4059 = vmatmul.mubr.msk.f32.vlgmr.msra.gmra.mrb[24].mxu1 %vm1410_vm5, %v2762_v6  ;;  %v3118_v6 = vld [vmem:[%s5283_s9 + $0x40] sm:$0xff] }
0x140e   :  { %4284 = vmatpush3.bf16.msra.mxu1 %v4283_v29  ;;  %v3160_v29 = vld [vmem:[%s5283_s9 + $0x190] sm:$0xff] }
0x140f   :  { %4286 = vmatprep.subr.bf16.mxu1 %v4285_v7  ;;  %v3161_v7 = vld [vmem:[%s5283_s9 + $0x198] sm:$0xff] }
0x1410   :  { %v4317_v52 = vpack.c.bf16 %v3161_v7, %v3160_v29  ;;  %v3539_v7 = vld [vmem:[%s5282_s8 + $0x90] ss:$0 sm:$0xff] }
0x1412   :  { %4288 = vmatpush3.bf16.msra.mxu1 %v4287_v55  ;;  %v3162_v55 = vld [vmem:[%s5283_s9 + $0x1a0] sm:$0xff] }
0x1413   :  { %4290 = vmatprep.subr.bf16.mxu1 %v4289_v56  ;;  %v3163_v56 = vld [vmem:[%s5283_s9 + $0x1a8] sm:$0xff] }
0x14e0   :  { %v4060_v9 = vpop.f32.mrb[24].mxu1 }
0x14e1   :  { %v2855_v11 = vadd.f32 %v4060_v9, %v3530_v8  ;;  %v2849_v12 = vpop.f32.mrb[25].mxu1  ;;  %v3136_v9 = vld [vmem:[%s5283_s9 + $0xd0] sm:$0xff] }
0x14e2   :  { %v2850_v13 = vadd.f32 %v3530_v8, %v2849_v12  ;;  %v3119_v8 = vld [vmem:[%s5283_s9 + $0x48] sm:$0xff] }
0x14e3   :  { %v2859_v14 = vadd.f32 %v2855_v11, %v2669_v59  ;;  %v3132_v59 = vld [vmem:[%s5283_s9 + $0xb0] sm:$0xff]  ;;  %v3137_v11 = vld [vmem:[%s5283_s9 + $0xd8] sm:$0xff]  ;;  %v4299_v12 = vpack.c.bf16 %v3119_v8, %v3118_v6  ;;  %v3122_v8 = vld [vmem:[%s5283_s9 + $0x60] sm:$0xff] }
0x14e4   :  { %v2858_v15 = vadd.f32 %v2850_v13, %v2668_v58  ;;  %v3115_v58 = vld [vmem:[%s5283_s9 + $0x28] sm:$0xff]  ;;  %v4293_v62 = vpack.c.bf16 %v3133_v60, %v3132_v59  ;;  %v4301_v13 = vpack.c.bf16 %v3137_v11, %v3136_v9  ;;  %v3146_v59 = vld [vmem:[%s5283_s9 + $0x120] sm:$0xff] }
0x14e5   :  { %v2867_v16 = vsel %vm185_vm1, %v2859_v14, 0.0  ;;  %v4291_v61 = vpack.c.bf16 %v3115_v58, %v3114_v57  ;;  %v4319_v57 = vpack.c.bf16 %v3145_v54, %v3144_v53  ;;  %v4321_v58 = vpack.c.bf16 %v3163_v56, %v3162_v55  ;;  %v3147_v60 = vld [vmem:[%s5283_s9 + $0x128] sm:$0xff]  ;;  %v3150_v11 = vld [vmem:[%s5283_s9 + $0x140] sm:$0xff] }
0x14e6   :  { %2868 = vadd.xlane.f32.xlu1 %v2867_v16  ;;  %v2864_v17 = vsel %vm185_vm1, %v2858_v15, 0.0  ;;  %v3138_v16 = vld [vmem:[%s5283_s9 + $0xe0] sm:$0xff]  ;;  %v3123_v9 = vld [vmem:[%s5283_s9 + $0x68] sm:$0xff] }
0x14e7   :  { %2865 = vadd.xlane.f32.xlu0 %v2864_v17  ;;  %4292 = vmatpush3.bf16.msra.mxu1 %v4291_v61  ;;  %v3139_v17 = vld [vmem:[%s5283_s9 + $0xe8] sm:$0xff]  ;;  %v3164_v61 = vld [vmem:[%s5283_s9 + $0x1b0] sm:$0xff] }
0x14e8   :  { %4294 = vmatprep.subr.bf16.mxu1 %v4293_v62  ;;  %v4323_v62 = vpack.c.bf16 %v3147_v60, %v3146_v59 }
0x14eb   :  { %4296 = vmatpush3.bf16.msra.mxu1 %v4295_v4  ;;  %v3167_v4 = vld [vmem:[%s5283_s9 + $0x1c8] sm:$0xff] }
0x14ec   :  { %4298 = vmatprep.subr.bf16.mxu1 %v4297_v5  ;;  %v4327_v5 = vpack.c.bf16 %v3149_v2, %v3148_v1  ;;  %v4329_v6 = vpack.c.bf16 %v3167_v4, %v3166_v3 }
0x14ef   :  { %4300 = vmatpush3.bf16.msra.mxu1 %v4299_v12  ;;  %v4307_v12 = vpack.c.bf16 %v3123_v9, %v3122_v8  ;;  %v3545_v9 = vld [vmem:[%s5284_s10] ss:$0 sm:$0xff] }
0x14f0   :  { %4302 = vmatprep.subr.bf16.mxu1 %v4301_v13  ;;  %v3151_v13 = vld [vmem:[%s5283_s9 + $0x148] sm:$0xff] }
0x1573   :  { %v2869_v18 = vpop.xlane.xlu1 %2868 }
0x1574   :  { %v2871_v19 = vmul.f32 0.03125, %v2869_v18  ;;  %v2866_v22 = vpop.xlane.xlu0 %2865 }
0x1575   :  { %v2870_v23 = vmul.f32 0.03125, %v2866_v22 }
0x1576   :  { %v4985_v24 = vsub.f32 %v2859_v14, %v2871_v19  ;;  %v3120_v14 = vld [vmem:[%s5283_s9 + $0x50] sm:$0xff]  ;;  %v4305_v19 = vpack.c.bf16 %v3139_v17, %v3138_v16  ;;  %v3141_v16 = vld [vmem:[%s5283_s9 + $0xf8] sm:$0xff] }
0x1577   :  { %v4987_v25 = vsub.f32 %v2858_v15, %v2870_v23  ;;  %v3121_v15 = vld [vmem:[%s5283_s9 + $0x58] sm:$0xff]  ;;  %v3168_v17 = vld [vmem:[%s5283_s9 + $0x1d0] sm:$0xff] }
0x1578   :  { %v2875_v26 = vmul.f32 %v4985_v24, %v4985_v24  ;;  %v4303_v18 = vpack.c.bf16 %v3121_v15, %v3120_v14  ;;  %v4331_v14 = vpack.c.bf16 %v3151_v13, %v3150_v11  ;;  %v3140_v15 = vld [vmem:[%s5283_s9 + $0xf0] sm:$0xff] }
0x1579   :  { %v2874_v27 = vmul.f32 %v4987_v25, %v4987_v25 }
0x157a   :  { %v2879_v28 = vsel %vm185_vm1, %v2875_v26, 0.0  ;;  %4304 = vmatpush3.bf16.msra.mxu1 %v4303_v18  ;;  %v4309_v18 = vpack.c.bf16 %v3141_v16, %v3140_v15 }
0x157b   :  { %2880 = vadd.xlane.f32.xlu1 %v2879_v28  ;;  %v2876_v31 = vsel %vm185_vm1, %v2874_v27, 0.0  ;;  %4306 = vmatprep.subr.bf16.mxu1 %v4305_v19  ;;  %v3169_v19 = vld [vmem:[%s5283_s9 + $0x1d8] sm:$0xff] }
0x157c   :  { %2877 = vadd.xlane.f32.xlu0 %v2876_v31 }
0x157e   :  { %4308 = vmatpush3.bf16.msra.mxu1 %v4307_v12 }
0x157f   :  { %4310 = vmatprep.subr.bf16.mxu1 %v4309_v18 }
0x1608   :  { %v2881_v22 = vpop.xlane.xlu1 %2880 }
0x1609   :  { %v2883_v23 = vmul.f32 0.03125, %v2881_v22  ;;  %v2878_v26 = vpop.xlane.xlu0 %2877  ;;  %v3124_v22 = vld [vmem:[%s5283_s9 + $0x70] sm:$0xff] }
0x160a   :  { %v2882_v27 = vmul.f32 0.03125, %v2878_v26  ;;  %v3125_v26 = vld [vmem:[%s5283_s9 + $0x78] sm:$0xff] }
0x160b   :  { %v2885_v28 = vadd.f32 1e-05, %v2883_v23  ;;  %v4333_v23 = vpack.c.bf16 %v3169_v19, %v3168_v17 }
0x160c   :  { %v2884_v31 = vadd.f32 1e-05, %v2882_v27  ;;  %v3152_v27 = vld [vmem:[%s5283_s9 + $0x150] sm:$0xff] }
0x160d   :  { %4394 = vrsqrt.f32 %v2885_v28  ;;  %v3153_v28 = vld [vmem:[%s5283_s9 + $0x158] sm:$0xff] }
0x160e   :  { %4396 = vrsqrt.f32 %v2884_v31  ;;  %v4311_v31 = vpack.c.bf16 %v3125_v26, %v3124_v22 }
0x1610   :  { %4312 = vmatpush3.bf16.msra.mxu1 %v4311_v31 }
0x1617   :  { %v4395_v32 = vpop.eup %4394 }
0x1618   :  { %v4397_v33 = vpop.eup %4396  ;;  %v2889_v36 = vmul.f32 %v4395_v32, %v4985_v24  ;;  %v2916_v24 = vld [vmem:[%s5282_s8 + $0x50] sm:$0xff]  ;;  %v4335_v32 = vpack.c.bf16 %v3153_v28, %v3152_v27 }
0x1619   :  { %v2888_v20 = vmul.f32 %v4397_v33, %v4987_v25  ;;  %v2921_v25 = vld [vmem:[%s5282_s8 + $0x78] sm:$0xff]  ;;  %v4279_v48 = vpack.c.bf16 %v2920_v43, %v2916_v24  ;;  %v3170_v33 = vld [vmem:[%s5283_s9 + $0x1e0] sm:$0xff] }
0x161a   :  { %v4277_v42 = vpack.c.bf16 %v2921_v25, %v2917_v38  ;;  %v2897_v44 = vmul.f32 %v3535_v21, %v2889_v36  ;;  %v4339_v36 = vpack.c.bf16 %v3155_v35, %v3154_v34  ;;  %v3173_v38 = vld [vmem:[%s5283_s9 + $0x1f8] sm:$0xff] }
0x161b   :  { %v2896_v39 = vmul.f32 %v3535_v21, %v2888_v20  ;;  %v3171_v21 = vld [vmem:[%s5283_s9 + $0x1e8] sm:$0xff] }
0x161c   :  { %v2905_v49 = vadd.f32 %v3536_v37, %v2897_v44  ;;  %v4337_v20 = vpack.c.bf16 %v3171_v21, %v3170_v33  ;;  %v3538_v44 = vld [vmem:[%s5282_s8 + $0x88] ss:$0 sm:$0xff] }
0x161d   :  { %v2904_v41 = vadd.f32 %v3536_v37, %v2896_v39  ;;  %v3172_v37 = vld [vmem:[%s5283_s9 + $0x1f0] sm:$0xff] }
0x161e   :  { %v4341_v25 = vpack.c.bf16 %v3173_v38, %v3172_v37  ;;  %v3156_v39 = vld [vmem:[%s5283_s9 + $0x170] sm:$0xff] }
0x161f   :  { %3541 = vmatmul.mubr.msk.f32.vlgmr.msra.gmra.mrb[28].mxu0 %vm185_vm1, %v2904_v41 }
0x1620   :  { %4276 = vmatpush1.bf16.msra.mxu0 %v4275_v40  ;;  %3018 = vmatprep.mubr.f32.mxu0 %v4406_v45  ;;  %v3157_v40 = vld [vmem:[%s5283_s9 + $0x178] sm:$0xff] }
0x1621   :  { %4278 = vmatprep.subr.bf16.mxu0 %v4277_v42  ;;  %v3537_v42 = vld [vmem:[%s5282_s8 + $0x80] ss:$0 sm:$0xff] }
0x1623   :  { %3542 = vmatmul.mubr.msk.f32.gmra.mrb[30].mxu0 %vm185_vm1, %v2905_v49 }
0x1624   :  { %4280 = vmatpush1.bf16.msra.mxu0 %v4279_v48  ;;  %3089 = vmatprep.mubr.f32.mxu0 %v4406_v45 }
0x1625   :  { %4314 = vmatprep.subr.bf16.mxu0 %v4313_v50 }
0x1627   :  { %3543 = vmatmul.mubr.msk.f32.vlgmr.msra.gmra.mrb[32].mxu0 %vm185_vm1, %v2904_v41  ;;  %v4343_v41 = vpack.c.bf16 %v3157_v40, %v3156_v39 }
0x1628   :  { %3095 = vmatprep.mubr.f32.mxu0 %v4406_v45  ;;  %4316 = vmatpush3.bf16.msra.mxu0 %v4315_v51  ;;  %v3165_v45 = vld [vmem:[%s5283_s9 + $0x1b8] sm:$0xff] }
0x1629   :  { %4318 = vmatprep.subr.bf16.mxu0 %v4317_v52  ;;  %v4325_v63 = vpack.c.bf16 %v3165_v45, %v3164_v61  ;;  %v3540_v51 = vld [vmem:[%s5282_s8 + $0x98] ss:$0 sm:$0xff] }
0x162b   :  { %3544 = vmatmul.mubr.msk.f32.gmra.mrb[34].mxu0 %vm185_vm1, %v2905_v49 }
0x162c   :  { %4320 = vmatpush3.bf16.msra.mxu0 %v4319_v57 }
0x162d   :  { %4322 = vmatprep.subr.bf16.mxu0 %v4321_v58 }
0x1630   :  { %4324 = vmatpush3.bf16.msra.mxu0 %v4323_v62 }
0x1631   :  { %4326 = vmatprep.subr.bf16.mxu0 %v4325_v63 }
0x1634   :  { %4328 = vmatpush3.bf16.msra.mxu0 %v4327_v5 }
0x1635   :  { %4330 = vmatprep.subr.bf16.mxu0 %v4329_v6 }
0x1638   :  { %4332 = vmatpush3.bf16.msra.mxu0 %v4331_v14 }
0x1639   :  { %4334 = vmatprep.subr.bf16.mxu0 %v4333_v23 }
0x163c   :  { %4336 = vmatpush3.bf16.msra.mxu0 %v4335_v32 }
0x163d   :  { %4338 = vmatprep.subr.bf16.mxu0 %v4337_v20 }
0x1640   :  { %4340 = vmatpush3.bf16.msra.mxu0 %v4339_v36 }
0x1641   :  { %4342 = vmatprep.subr.bf16.mxu0 %v4341_v25 }
0x1644   :  { %4344 = vmatpush3.bf16.msra.mxu0 %v4343_v41 }
0x16f2   :  { %v3014_v24 = vpop.f32.mrb[28].mxu0 }
0x16f3   :  { %v3015_v43 = vadd.f32 %v3537_v42, %v3014_v24  ;;  %v3016_v46 = vpop.f32.mrb[29].mxu0 }
0x16f4   :  { %v3017_v47 = vadd.f32 %v3538_v44, %v3016_v46 }
0x16f5   :  { %v3102_v50 = vmax.f32 %v3015_v43, 0.0 }
0x16f6   :  { %v3103_v48 = vmax.f32 %v3017_v47, 0.0  ;;  %v3020_v49 = vpop.f32.mrb[30].mxu0 }
0x16f7   :  { %v3021_v30 = vadd.f32 %v3537_v42, %v3020_v49  ;;  %v3022_v10 = vpop.f32.mrb[31].mxu0 }
0x16f8   :  { %v3023_v29 = vadd.f32 %v3538_v44, %v3022_v10  ;;  %3245 = vmatprep.mubr.f32.mxu1 %v3103_v48 }
0x16f9   :  { %3246 = vmatmul.mubr.f32.vlgmr.msra.gmra.mrb[26].mxu1 %v3102_v50  ;;  %v3106_v54 = vmax.f32 %v3021_v30, 0.0 }
0x16fa   :  { %v3107_v52 = vmax.f32 %v3023_v29, 0.0  ;;  %v3091_v53 = vpop.f32.mrb[32].mxu0 }
0x16fb   :  { %v3092_v55 = vadd.f32 %v3539_v7, %v3091_v53  ;;  %v3093_v56 = vpop.f32.mrb[33].mxu0 }
0x16fc   :  { %v3094_v57 = vadd.f32 %v3540_v51, %v3093_v56  ;;  %3250 = vmatprep.mubr.f32.mxu1 %v3107_v52 }
0x16fd   :  { %3251 = vmatmul.mubr.f32.gmra.mrb[28].mxu1 %v3106_v54  ;;  %v3104_v60 = vmax.f32 %v3092_v55, 0.0 }
0x16fe   :  { %v3105_v58 = vmax.f32 %v3094_v57, 0.0  ;;  %v3097_v59 = vpop.f32.mrb[34].mxu0 }
0x16ff   :  { %v3098_v61 = vadd.f32 %v3539_v7, %v3097_v59  ;;  %v3099_v45 = vpop.f32.mrb[35].mxu0 }
0x1700   :  { %v3100_v62 = vadd.f32 %v3540_v51, %v3099_v45  ;;  %3320 = vmatprep.mubr.f32.mxu0 %v3105_v58 }
0x1701   :  { %3321 = vmatmul.mubr.f32.vlgmr.msra.gmra.mrb[36].mxu0 %v3104_v60  ;;  %v3108_v1 = vmax.f32 %v3098_v61, 0.0 }
0x1702   :  { %v3109_v63 = vmax.f32 %v3100_v62, 0.0 }
0x1704   :  { %3325 = vmatprep.mubr.f32.mxu0 %v3109_v63 }
0x1705   :  { %3326 = vmatmul.mubr.f32.gmra.mrb[38].mxu0 %v3108_v1 }
0x17cc   :  { %v3734_v2 = vpop.f32.mrb[26].mxu1 }
0x17cd   :  { %v3735_v3 = vpop.f32.mrb[27].mxu1 }
0x17ce   :  { %v3736_v4 = vadd.f32 %v3735_v3, %v3734_v2 }
0x17d0   :  { %v3737_v5 = vpop.f32.mrb[28].mxu1  ;;  %v3248_v13 = vadd.f32 %v3736_v4, %v3545_v9 }
0x17d1   :  { %v3738_v6 = vpop.f32.mrb[29].mxu1 }
0x17d2   :  { %v3739_v8 = vadd.f32 %v3738_v6, %v3737_v5 }
0x17d4   :  { %v3772_v11 = vpop.f32.mrb[36].mxu0  ;;  %v3253_v18 = vadd.f32 %v3739_v8, %v3545_v9 }
0x17d5   :  { %v3773_v12 = vpop.f32.mrb[37].mxu0 }
0x17d6   :  { %v3774_v14 = vadd.f32 %v3773_v12, %v3772_v11 }
0x17d8   :  { %v3323_v15 = vadd.f32 %v3774_v14, %v3248_v13  ;;  %v3775_v16 = vpop.f32.mrb[38].mxu0 }
0x17d9   :  { %v3776_v17 = vpop.f32.mrb[39].mxu0 }
0x17da   :  { %v3333_v19 = vand.u32 2147483647, %v3323_v15  ;;  %v3777_v22 = vadd.f32 %v3776_v17, %v3775_v16  ;;  %v3331_v36 = vmax.f32 %v3323_v15, 0.0 }
0x17dc   :  { %v3335_v23 = vsub.f32 0.0, %v3333_v19  ;;  %v3328_v26 = vadd.f32 %v3777_v22, %v3253_v18 }
0x17de   :  { %v3337_v27 = vmul.f32 1.442695, %v3335_v23  ;;  %v3334_v28 = vand.u32 2147483647, %v3328_v26  ;;  %v3332_v40 = vmax.f32 %v3328_v26, 0.0 }
0x17e0   :  { %4398 = vpow2.f32 %v3337_v27  ;;  %v3336_v31 = vsub.f32 0.0, %v3334_v28 }
0x17e2   :  { %v3339_v32 = vmul.f32 1.442695, %v3336_v31 }
0x17e4   :  { %4400 = vpow2.f32 %v3339_v32 }
0x17ea   :  { %v4399_v33 = vpop.eup %4398 }
0x17eb   :  { %v3341_v21 = vadd.f32 1.0, %v4399_v33 }
0x17ed   :  { %4402 = vlog2.f32 %v3341_v21 }
0x17ee   :  { %v4401_v20 = vpop.eup %4400 }
0x17ef   :  { %v3342_v34 = vadd.f32 1.0, %v4401_v20 }
0x17f1   :  { %4404 = vlog2.f32 %v3342_v34 }
0x17f7   :  { %v4403_v35 = vpop.eup %4402 }
0x17f8   :  { %v3344_v37 = vmul.f32 0.6931472, %v4403_v35 }
0x17fa   :  { %v3347_v38 = vadd.f32 %v3344_v37, %v3331_v36 }
0x17fb   :  { %v4405_v25 = vpop.eup %4404 }
0x17fc   :  { %v3352_v39 = vsel %vm3351_vm8, %v3347_v38, %v3323_v15  ;;  %v3346_v41 = vmul.f32 0.6931472, %v4405_v25 }
0x17fd   :  { %3354 = vst [vmem:[%s5285_s11] sm:$0xff] %v3352_v39 }
0x17fe   :  { %v3348_v42 = vadd.f32 %v3346_v41, %v3332_v40 }
0x1800   :  { %v3353_v44 = vsel %vm3351_vm8, %v3348_v42, %v3328_v26 }
0x1801   :  { %3355 = vst [vmem:[%s5285_s11 + $0x8] sm:$0xff] %v3353_v44 }

</bundles_post_ra>
